<compile_context>
chip_gen: v5e
topology: v5e:2x2
jax: 0.10.0
libtpu: 0.0.40
codegen_flags: <defaults>
</compile_context>

<pallas_src>
import numpy as np
import jax
import jax.numpy as jnp
from jax.experimental import pallas as pl
from jax.experimental.pallas import tpu as pltpu

# Older jax releases expose this class under a different name.
_COMPILER_PARAMS_CLS = getattr(pltpu, "CompilerParams", None)
if _COMPILER_PARAMS_CLS is None:
    _COMPILER_PARAMS_CLS = getattr(pltpu, "TPUCompilerParams")


# ----------------------------------------------------------------------------
# Fused Net kernel.
#   conv layer l (kernel 5x5, VALID) + width-max-pool is computed as
#     C_even = sum_kh X_kh @ We[kh],  C_odd = sum_kh X_kh @ Wo[kh]
#     M = max(C_even, C_odd) + bias
#   where X_kh are 24/8 consecutive input rows and We/Wo are host-built banded
#   matrices whose columns are laid out as (channel * pooled_width + w).
#   Height pooling is a sublane-stride-2 max read from a lane-dense scratch.
# ----------------------------------------------------------------------------
def _net_kernel(x_ref, w1e_ref, w1o_ref, b1_ref, w2e_ref, w2o_ref, b2_ref,
                wf1_ref, bf1_ref, wf2_ref, bf2_ref, o_ref, s1_ref, s2_ref):
    bt = x_ref.shape[0]
    f32 = jnp.float32
    bf16 = jnp.bfloat16

    # ---- conv1: (bt, 28, 28) -> pooled (bt, 12, 120)  [lanes = c*12 + w] ----
    c1e = jnp.zeros((bt * 24, 120), f32)
    c1o = jnp.zeros((bt * 24, 120), f32)
    for kh in range(5):
        rows = x_ref[:, pl.ds(kh, 24), :].reshape(bt * 24, 28).astype(bf16)
        c1e = c1e + jnp.dot(rows, w1e_ref[kh], preferred_element_type=f32)
        c1o = c1o + jnp.dot(rows, w1o_ref[kh], preferred_element_type=f32)
    m1 = jnp.maximum(c1e, c1o) + b1_ref[...]            # width-pair max + bias
    s1_ref[...] = m1.reshape(bt, 24, 120)
    p1 = jnp.maximum(s1_ref[:, pl.ds(0, 12, 2), :],     # height-pair max
                     s1_ref[:, pl.ds(1, 12, 2), :])
    p1 = jnp.maximum(p1, 0.0)                           # ReLU -> (bt, 12, 120)

    # ---- conv2 (Dropout2d == identity in eval): -> pooled (bt, 4, 80) ----
    c2e = jnp.zeros((bt * 8, 80), f32)
    c2o = jnp.zeros((bt * 8, 80), f32)
    for kh in range(5):
        rows = p1[:, kh:kh + 8, :].reshape(bt * 8, 120).astype(bf16)
        c2e = c2e + jnp.dot(rows, w2e_ref[kh], preferred_element_type=f32)
        c2o = c2o + jnp.dot(rows, w2o_ref[kh], preferred_element_type=f32)
    m2 = jnp.maximum(c2e, c2o) + b2_ref[...]
    s2_ref[...] = m2.reshape(bt, 8, 80)
    p2 = jnp.maximum(s2_ref[:, pl.ds(0, 4, 2), :],
                     s2_ref[:, pl.ds(1, 4, 2), :])
    p2 = jnp.maximum(p2, 0.0)                           # (bt, 4, 80) lanes = c*4+w

    # ---- fc1 + ReLU: NCHW flatten absorbed into 4 host-permuted weight slabs ----
    z = jnp.zeros((bt, 50), f32)
    for h in range(4):
        z = z + jnp.dot(p2[:, h, :].astype(bf16), wf1_ref[h],
                        preferred_element_type=f32)
    z = jnp.maximum(z + bf1_ref[...], 0.0)
    # F.dropout == identity in eval.

    # ---- fc2 + softmax(dim=1) ----
    logits = jnp.dot(z.astype(bf16), wf2_ref[...],
                     preferred_element_type=f32) + bf2_ref[...]
    m = jnp.max(logits, axis=1, keepdims=True)
    e = jnp.exp(logits - m)
    s = jnp.sum(e, axis=1, keepdims=True)
    r = pl.reciprocal(s, approx=True)                   # EUP + one Newton step
    r = r * (2.0 - s * r)
    o_ref[...] = (e * r).astype(o_ref.dtype)


def _pick_batch_tile(B):
    """Largest multiple-of-8 divisor of B, capped at 128 (VMEM / megacore)."""
    if B <= 8:
        return B
    cands = [bt for bt in range(8, min(B, 128) + 1, 8) if B % bt == 0]
    return cands[-1] if cands else B


def net_forward(x_nchw, kp, batch_tile=None):
    """x_nchw: (B, 1, 28, 28) f32.  kp: kernel-layout params.  Returns (B, 10)."""
    B = x_nchw.shape[0]
    bt = _pick_batch_tile(B) if batch_tile is None else batch_tile
    assert B % bt == 0 and (bt == B or bt % 8 == 0), "bad batch_tile"
    # Cin == 1 -> drop the channel dim entirely (pure reshape, lane-dense DMA).
    x = x_nchw.reshape(B, 28, 28)

    return pl.pallas_call(
        _net_kernel,
        out_shape=jax.ShapeDtypeStruct((B, 10), jnp.float32),
        grid=(B // bt,),
        in_specs=[
            pl.BlockSpec((bt, 28, 28), lambda i: (i, 0, 0)),     # x
            pl.BlockSpec((5, 28, 120), lambda i: (0, 0, 0)),     # conv1 banded even
            pl.BlockSpec((5, 28, 120), lambda i: (0, 0, 0)),     # conv1 banded odd
            pl.BlockSpec((1, 120), lambda i: (0, 0)),            # conv1 bias
            pl.BlockSpec((5, 120, 80), lambda i: (0, 0, 0)),     # conv2 banded even
            pl.BlockSpec((5, 120, 80), lambda i: (0, 0, 0)),     # conv2 banded odd
            pl.BlockSpec((1, 80), lambda i: (0, 0)),             # conv2 bias
            pl.BlockSpec((4, 80, 50), lambda i: (0, 0, 0)),      # fc1 per-row slabs
            pl.BlockSpec((1, 50), lambda i: (0, 0)),             # fc1 bias
            pl.BlockSpec((50, 10), lambda i: (0, 0)),            # fc2 weight
            pl.BlockSpec((1, 10), lambda i: (0, 0)),             # fc2 bias
        ],
        out_specs=pl.BlockSpec((bt, 10), lambda i: (i, 0)),
        scratch_shapes=[
            pltpu.VMEM((bt, 24, 120), jnp.float32),   # conv1 pre-height-pool
            pltpu.VMEM((bt, 8, 80), jnp.float32),     # conv2 pre-height-pool
        ],
        compiler_params=_COMPILER_PARAMS_CLS(
            dimension_semantics=("parallel",),        # batch tiles -> both TCs
            vmem_limit_bytes=48 * 1024 * 1024,        # <= v7x's 64 MiB physical
        ),
    )(x, kp["w1e"], kp["w1o"], kp["b1"], kp["w2e"], kp["w2o"], kp["b2"],
      kp["wf1"], kp["bf1"], kp["wf2"], kp["bf2"])


# ----------------------------------------------------------------------------
# Parameters (PyTorch layout) + host-side conversion to kernel layout.
# ----------------------------------------------------------------------------
def init_torch_style_params(key):
    ks = jax.random.split(key, 8)
    return dict(
        conv1_w=jax.random.normal(ks[0], (10, 1, 5, 5), jnp.float32) * 0.1,
        conv1_b=jax.random.normal(ks[1], (10,), jnp.float32) * 0.1,
        conv2_w=jax.random.normal(ks[2], (20, 10, 5, 5), jnp.float32) * 0.05,
        conv2_b=jax.random.normal(ks[3], (20,), jnp.float32) * 0.1,
        fc1_w=jax.random.normal(ks[4], (50, 320), jnp.float32) * 0.05,
        fc1_b=jax.random.normal(ks[5], (50,), jnp.float32) * 0.1,
        fc2_w=jax.random.normal(ks[6], (10, 50), jnp.float32) * 0.1,
        fc2_b=jax.random.normal(ks[7], (10,), jnp.float32) * 0.1,
    )


def _banded_conv_weights(w, in_w):
    """w: (Cout, Cin, 5, 5).  Returns (We, Wo), each (5, Cin*in_w, Cout*PW):
    We[kh][ci*in_w + iw, co*PW + q] = w[co, ci, kh, iw - 2q]      (band)
    Wo[kh][ci*in_w + iw, co*PW + q] = w[co, ci, kh, iw - (2q+1)]  (band)
    so that  sum_kh rows(kh) @ We[kh]  is the conv output at even (resp. odd)
    columns, laid out lane-dense as (channel * pooled_width + q)."""
    w = np.asarray(w, np.float32)
    cout, cin, K, _ = w.shape
    out_w = in_w - K + 1
    pw = out_w // 2
    we = np.zeros((K, cin * in_w, cout * pw), np.float32)
    wo = np.zeros((K, cin * in_w, cout * pw), np.float32)
    for kh in range(K):
        for co in range(cout):
            for ci in range(cin):
                for q in range(pw):
                    for kw in range(K):
                        we[kh, ci * in_w + 2 * q + kw, co * pw + q] = w[co, ci, kh, kw]
                        wo[kh, ci * in_w + 2 * q + 1 + kw, co * pw + q] = w[co, ci, kh, kw]
    return we, wo


def convert_params_for_kernel(pt):
    bf16 = jnp.bfloat16
    w1e, w1o = _banded_conv_weights(pt["conv1_w"], 28)   # (5, 28, 120)
    w2e, w2o = _banded_conv_weights(pt["conv2_w"], 12)   # (5, 120, 80)
    # fc1: PyTorch flatten index = c*16 + h*4 + w.  Kernel consumes one slab per
    # pooled row h with columns (c*4 + w)  ->  (4, 80, 50), one-time host cost.
    fc1 = np.asarray(pt["fc1_w"], np.float32).reshape(50, 20, 4, 4)  # (j, c, h, w)
    wf1 = np.transpose(fc1, (2, 1, 3, 0)).reshape(4, 80, 50)         # (h, c*4+w, j)
    return dict(
        w1e=jnp.asarray(w1e, bf16), w1o=jnp.asarray(w1o, bf16),
        b1=jnp.asarray(np.repeat(np.asarray(pt["conv1_b"], np.float32), 12)[None, :]),
        w2e=jnp.asarray(w2e, bf16), w2o=jnp.asarray(w2o, bf16),
        b2=jnp.asarray(np.repeat(np.asarray(pt["conv2_b"], np.float32), 4)[None, :]),
        wf1=jnp.asarray(wf1, bf16),
        bf1=jnp.asarray(pt["fc1_b"], jnp.float32).reshape(1, 50),
        wf2=jnp.asarray(np.asarray(pt["fc2_w"], np.float32).T, bf16),
        bf2=jnp.asarray(pt["fc2_b"], jnp.float32).reshape(1, 10),
    )


# ----------------------------------------------------------------------------
# Pure-JAX reference (mirrors the PyTorch module exactly), for validation.
# ----------------------------------------------------------------------------
def reference_forward(x_nchw, pt):
    dn = ("NCHW", "OIHW", "NCHW")
    y = jax.lax.conv_general_dilated(x_nchw, pt["conv1_w"], (1, 1), "VALID",
                                     dimension_numbers=dn)
    y = y + pt["conv1_b"].reshape(1, -1, 1, 1)
    y = jax.lax.reduce_window(y, -jnp.inf, jax.lax.max,
                              (1, 1, 2, 2), (1, 1, 2, 2), "VALID")
    y = jnp.maximum(y, 0.0)
    y = jax.lax.conv_general_dilated(y, pt["conv2_w"], (1, 1), "VALID",
                                     dimension_numbers=dn)
    y = y + pt["conv2_b"].reshape(1, -1, 1, 1)
    y = jax.lax.reduce_window(y, -jnp.inf, jax.lax.max,
                              (1, 1, 2, 2), (1, 1, 2, 2), "VALID")
    y = jnp.maximum(y, 0.0)
    y = y.reshape(y.shape[0], 320)                           # NCHW flatten
    y = jnp.maximum(y @ pt["fc1_w"].T + pt["fc1_b"], 0.0)
    y = y @ pt["fc2_w"].T + pt["fc2_b"]
    return jax.nn.softmax(y, axis=1)


if __name__ == "__main__":
    key = jax.random.PRNGKey(0)
    kx, kparam = jax.random.split(key)
    # MNIST-shaped input (batch=2), NCHW like the PyTorch module expects.
    x = jax.random.normal(kx, (2, 1, 28, 28), jnp.float32)
    pt_params = init_torch_style_params(kparam)
    kparams = convert_params_for_kernel(pt_params)

    out = net_forward(x, kparams)
    out = jax.block_until_ready(out)
    ref = reference_forward(x, pt_params)

    assert out.shape == (2, 10)
    assert bool(jnp.all(jnp.isfinite(out)))
    max_err = float(jnp.max(jnp.abs(out - ref)))
    # bf16 MXU operands with f32 accumulation: probabilities agree to ~1e-3.
    assert max_err < 1e-2, f"mismatch vs reference: {max_err}"
    assert bool(jnp.all(jnp.abs(jnp.sum(out, axis=1) - 1.0) < 5e-3))
    print("KERNEL_OK")
</pallas_src>

<mosaic_0001>
module attributes {stable_mosaic.version = 11 : i64} {
  func.func @_net_kernel(%arg0: i32, %arg1: memref<2x28x28xf32, #tpu.memory_space<vmem>>, %arg2: memref<5x28x120xbf16, #tpu.memory_space<vmem>>, %arg3: memref<5x28x120xbf16, #tpu.memory_space<vmem>>, %arg4: memref<1x120xf32, #tpu.memory_space<vmem>>, %arg5: memref<5x120x80xbf16, #tpu.memory_space<vmem>>, %arg6: memref<5x120x80xbf16, #tpu.memory_space<vmem>>, %arg7: memref<1x80xf32, #tpu.memory_space<vmem>>, %arg8: memref<4x80x50xbf16, #tpu.memory_space<vmem>>, %arg9: memref<1x50xf32, #tpu.memory_space<vmem>>, %arg10: memref<50x10xbf16, #tpu.memory_space<vmem>>, %arg11: memref<1x10xf32, #tpu.memory_space<vmem>>, %arg12: memref<2x10xf32, #tpu.memory_space<vmem>>, %arg13: memref<2x24x120xf32, #tpu.memory_space<vmem>>, %arg14: memref<2x8x80xf32, #tpu.memory_space<vmem>>) attributes {dimension_semantics = [#tpu.dimension_semantics<parallel>], iteration_bounds = array<i64: 1>, scalar_prefetch = 0 : i64, scratch_operands = 2 : i64, tpu.core_type = #tpu.core_type<tc>, window_params = [{transform_indices = @transform_0, window_bounds = array<i64: 2, 28, 28>}, {pipeline_mode = #tpu.pipeline_mode<synchronous>, transform_indices = @transform_1, window_bounds = array<i64: 5, 28, 120>}, {pipeline_mode = #tpu.pipeline_mode<synchronous>, transform_indices = @transform_2, window_bounds = array<i64: 5, 28, 120>}, {pipeline_mode = #tpu.pipeline_mode<synchronous>, transform_indices = @transform_3, window_bounds = array<i64: 1, 120>}, {pipeline_mode = #tpu.pipeline_mode<synchronous>, transform_indices = @transform_4, window_bounds = array<i64: 5, 120, 80>}, {pipeline_mode = #tpu.pipeline_mode<synchronous>, transform_indices = @transform_5, window_bounds = array<i64: 5, 120, 80>}, {pipeline_mode = #tpu.pipeline_mode<synchronous>, transform_indices = @transform_6, window_bounds = array<i64: 1, 80>}, {pipeline_mode = #tpu.pipeline_mode<synchronous>, transform_indices = @transform_7, window_bounds = array<i64: 4, 80, 50>}, {pipeline_mode = #tpu.pipeline_mode<synchronous>, transform_indices = @transform_8, window_bounds = array<i64: 1, 50>}, {pipeline_mode = #tpu.pipeline_mode<synchronous>, transform_indices = @transform_9, window_bounds = array<i64: 50, 10>}, {pipeline_mode = #tpu.pipeline_mode<synchronous>, transform_indices = @transform_10, window_bounds = array<i64: 1, 10>}, {transform_indices = @transform_11, window_bounds = array<i64: 2, 10>}]} {
    %cst = arith.constant 0.000000e+00 : f32
    %0 = vector.broadcast %cst : f32 to vector<48x120xf32>
    %cst_0 = arith.constant 0.000000e+00 : f32
    %1 = vector.broadcast %cst_0 : f32 to vector<48x120xf32>
    %c0 = arith.constant 0 : index
    %c0_1 = arith.constant 0 : index
    %c0_2 = arith.constant 0 : index
    %2 = vector.load %arg1[%c0, %c0_1, %c0_2] : memref<2x28x28xf32, #tpu.memory_space<vmem>>, vector<2x24x28xf32>
    %3 = vector.shape_cast %2 : vector<2x24x28xf32> to vector<48x28xf32>
    %4 = arith.truncf %3 : vector<48x28xf32> to vector<48x28xbf16>
    %c0_3 = arith.constant 0 : index
    %c0_4 = arith.constant 0 : index
    %c0_5 = arith.constant 0 : index
    %5 = vector.load %arg2[%c0_3, %c0_4, %c0_5] : memref<5x28x120xbf16, #tpu.memory_space<vmem>>, vector<1x28x120xbf16>
    %6 = vector.shape_cast %5 : vector<1x28x120xbf16> to vector<28x120xbf16>
    %cst_6 = arith.constant dense<0.000000e+00> : vector<48x120xf32>
    %7 = tpu.matmul %4, %6, %cst_6 {dimension_numbers = #tpu.dot_dimension_numbers<[1], [0], [0], [1], [0, 0, 1, 1], [], []>} : vector<48x28xbf16>, vector<28x120xbf16>, vector<48x120xf32> -> vector<48x120xf32>
    %8 = arith.addf %0, %7 : vector<48x120xf32>
    %c0_7 = arith.constant 0 : index
    %c0_8 = arith.constant 0 : index
    %c0_9 = arith.constant 0 : index
    %9 = vector.load %arg3[%c0_7, %c0_8, %c0_9] : memref<5x28x120xbf16, #tpu.memory_space<vmem>>, vector<1x28x120xbf16>
    %10 = vector.shape_cast %9 : vector<1x28x120xbf16> to vector<28x120xbf16>
    %cst_10 = arith.constant dense<0.000000e+00> : vector<48x120xf32>
    %11 = tpu.matmul %4, %10, %cst_10 {dimension_numbers = #tpu.dot_dimension_numbers<[1], [0], [0], [1], [0, 0, 1, 1], [], []>} : vector<48x28xbf16>, vector<28x120xbf16>, vector<48x120xf32> -> vector<48x120xf32>
    %12 = arith.addf %1, %11 : vector<48x120xf32>
    %c0_11 = arith.constant 0 : index
    %c1 = arith.constant 1 : index
    %c0_12 = arith.constant 0 : index
    %13 = vector.load %arg1[%c0_11, %c1, %c0_12] : memref<2x28x28xf32, #tpu.memory_space<vmem>>, vector<2x24x28xf32>
    %14 = vector.shape_cast %13 : vector<2x24x28xf32> to vector<48x28xf32>
    %15 = arith.truncf %14 : vector<48x28xf32> to vector<48x28xbf16>
    %c1_13 = arith.constant 1 : index
    %c0_14 = arith.constant 0 : index
    %c0_15 = arith.constant 0 : index
    %16 = vector.load %arg2[%c1_13, %c0_14, %c0_15] : memref<5x28x120xbf16, #tpu.memory_space<vmem>>, vector<1x28x120xbf16>
    %17 = vector.shape_cast %16 : vector<1x28x120xbf16> to vector<28x120xbf16>
    %cst_16 = arith.constant dense<0.000000e+00> : vector<48x120xf32>
    %18 = tpu.matmul %15, %17, %cst_16 {dimension_numbers = #tpu.dot_dimension_numbers<[1], [0], [0], [1], [0, 0, 1, 1], [], []>} : vector<48x28xbf16>, vector<28x120xbf16>, vector<48x120xf32> -> vector<48x120xf32>
    %19 = arith.addf %8, %18 : vector<48x120xf32>
    %c1_17 = arith.constant 1 : index
    %c0_18 = arith.constant 0 : index
    %c0_19 = arith.constant 0 : index
    %20 = vector.load %arg3[%c1_17, %c0_18, %c0_19] : memref<5x28x120xbf16, #tpu.memory_space<vmem>>, vector<1x28x120xbf16>
    %21 = vector.shape_cast %20 : vector<1x28x120xbf16> to vector<28x120xbf16>
    %cst_20 = arith.constant dense<0.000000e+00> : vector<48x120xf32>
    %22 = tpu.matmul %15, %21, %cst_20 {dimension_numbers = #tpu.dot_dimension_numbers<[1], [0], [0], [1], [0, 0, 1, 1], [], []>} : vector<48x28xbf16>, vector<28x120xbf16>, vector<48x120xf32> -> vector<48x120xf32>
    %23 = arith.addf %12, %22 : vector<48x120xf32>
    %c0_21 = arith.constant 0 : index
    %c2 = arith.constant 2 : index
    %c0_22 = arith.constant 0 : index
    %24 = vector.load %arg1[%c0_21, %c2, %c0_22] : memref<2x28x28xf32, #tpu.memory_space<vmem>>, vector<2x24x28xf32>
    %25 = vector.shape_cast %24 : vector<2x24x28xf32> to vector<48x28xf32>
    %26 = arith.truncf %25 : vector<48x28xf32> to vector<48x28xbf16>
    %c2_23 = arith.constant 2 : index
    %c0_24 = arith.constant 0 : index
    %c0_25 = arith.constant 0 : index
    %27 = vector.load %arg2[%c2_23, %c0_24, %c0_25] : memref<5x28x120xbf16, #tpu.memory_space<vmem>>, vector<1x28x120xbf16>
    %28 = vector.shape_cast %27 : vector<1x28x120xbf16> to vector<28x120xbf16>
    %cst_26 = arith.constant dense<0.000000e+00> : vector<48x120xf32>
    %29 = tpu.matmul %26, %28, %cst_26 {dimension_numbers = #tpu.dot_dimension_numbers<[1], [0], [0], [1], [0, 0, 1, 1], [], []>} : vector<48x28xbf16>, vector<28x120xbf16>, vector<48x120xf32> -> vector<48x120xf32>
    %30 = arith.addf %19, %29 : vector<48x120xf32>
    %c2_27 = arith.constant 2 : index
    %c0_28 = arith.constant 0 : index
    %c0_29 = arith.constant 0 : index
    %31 = vector.load %arg3[%c2_27, %c0_28, %c0_29] : memref<5x28x120xbf16, #tpu.memory_space<vmem>>, vector<1x28x120xbf16>
    %32 = vector.shape_cast %31 : vector<1x28x120xbf16> to vector<28x120xbf16>
    %cst_30 = arith.constant dense<0.000000e+00> : vector<48x120xf32>
    %33 = tpu.matmul %26, %32, %cst_30 {dimension_numbers = #tpu.dot_dimension_numbers<[1], [0], [0], [1], [0, 0, 1, 1], [], []>} : vector<48x28xbf16>, vector<28x120xbf16>, vector<48x120xf32> -> vector<48x120xf32>
    %34 = arith.addf %23, %33 : vector<48x120xf32>
    %c0_31 = arith.constant 0 : index
    %c3 = arith.constant 3 : index
    %c0_32 = arith.constant 0 : index
    %35 = vector.load %arg1[%c0_31, %c3, %c0_32] : memref<2x28x28xf32, #tpu.memory_space<vmem>>, vector<2x24x28xf32>
    %36 = vector.shape_cast %35 : vector<2x24x28xf32> to vector<48x28xf32>
    %37 = arith.truncf %36 : vector<48x28xf32> to vector<48x28xbf16>
    %c3_33 = arith.constant 3 : index
    %c0_34 = arith.constant 0 : index
    %c0_35 = arith.constant 0 : index
    %38 = vector.load %arg2[%c3_33, %c0_34, %c0_35] : memref<5x28x120xbf16, #tpu.memory_space<vmem>>, vector<1x28x120xbf16>
    %39 = vector.shape_cast %38 : vector<1x28x120xbf16> to vector<28x120xbf16>
    %cst_36 = arith.constant dense<0.000000e+00> : vector<48x120xf32>
    %40 = tpu.matmul %37, %39, %cst_36 {dimension_numbers = #tpu.dot_dimension_numbers<[1], [0], [0], [1], [0, 0, 1, 1], [], []>} : vector<48x28xbf16>, vector<28x120xbf16>, vector<48x120xf32> -> vector<48x120xf32>
    %41 = arith.addf %30, %40 : vector<48x120xf32>
    %c3_37 = arith.constant 3 : index
    %c0_38 = arith.constant 0 : index
    %c0_39 = arith.constant 0 : index
    %42 = vector.load %arg3[%c3_37, %c0_38, %c0_39] : memref<5x28x120xbf16, #tpu.memory_space<vmem>>, vector<1x28x120xbf16>
    %43 = vector.shape_cast %42 : vector<1x28x120xbf16> to vector<28x120xbf16>
    %cst_40 = arith.constant dense<0.000000e+00> : vector<48x120xf32>
    %44 = tpu.matmul %37, %43, %cst_40 {dimension_numbers = #tpu.dot_dimension_numbers<[1], [0], [0], [1], [0, 0, 1, 1], [], []>} : vector<48x28xbf16>, vector<28x120xbf16>, vector<48x120xf32> -> vector<48x120xf32>
    %45 = arith.addf %34, %44 : vector<48x120xf32>
    %c0_41 = arith.constant 0 : index
    %c4 = arith.constant 4 : index
    %c0_42 = arith.constant 0 : index
    %46 = vector.load %arg1[%c0_41, %c4, %c0_42] : memref<2x28x28xf32, #tpu.memory_space<vmem>>, vector<2x24x28xf32>
    %47 = vector.shape_cast %46 : vector<2x24x28xf32> to vector<48x28xf32>
    %48 = arith.truncf %47 : vector<48x28xf32> to vector<48x28xbf16>
    %c4_43 = arith.constant 4 : index
    %c0_44 = arith.constant 0 : index
    %c0_45 = arith.constant 0 : index
    %49 = vector.load %arg2[%c4_43, %c0_44, %c0_45] : memref<5x28x120xbf16, #tpu.memory_space<vmem>>, vector<1x28x120xbf16>
    %50 = vector.shape_cast %49 : vector<1x28x120xbf16> to vector<28x120xbf16>
    %cst_46 = arith.constant dense<0.000000e+00> : vector<48x120xf32>
    %51 = tpu.matmul %48, %50, %cst_46 {dimension_numbers = #tpu.dot_dimension_numbers<[1], [0], [0], [1], [0, 0, 1, 1], [], []>} : vector<48x28xbf16>, vector<28x120xbf16>, vector<48x120xf32> -> vector<48x120xf32>
    %52 = arith.addf %41, %51 : vector<48x120xf32>
    %c4_47 = arith.constant 4 : index
    %c0_48 = arith.constant 0 : index
    %c0_49 = arith.constant 0 : index
    %53 = vector.load %arg3[%c4_47, %c0_48, %c0_49] : memref<5x28x120xbf16, #tpu.memory_space<vmem>>, vector<1x28x120xbf16>
    %54 = vector.shape_cast %53 : vector<1x28x120xbf16> to vector<28x120xbf16>
    %cst_50 = arith.constant dense<0.000000e+00> : vector<48x120xf32>
    %55 = tpu.matmul %48, %54, %cst_50 {dimension_numbers = #tpu.dot_dimension_numbers<[1], [0], [0], [1], [0, 0, 1, 1], [], []>} : vector<48x28xbf16>, vector<28x120xbf16>, vector<48x120xf32> -> vector<48x120xf32>
    %56 = arith.addf %45, %55 : vector<48x120xf32>
    %57 = arith.maximumf %52, %56 : vector<48x120xf32>
    %c0_51 = arith.constant 0 : index
    %c0_52 = arith.constant 0 : index
    %58 = vector.load %arg4[%c0_51, %c0_52] : memref<1x120xf32, #tpu.memory_space<vmem>>, vector<1x120xf32>
    %59 = vector.broadcast %58 : vector<1x120xf32> to vector<48x120xf32>
    %60 = arith.addf %57, %59 : vector<48x120xf32>
    %61 = vector.shape_cast %60 : vector<48x120xf32> to vector<2x24x120xf32>
    %c0_53 = arith.constant 0 : index
    %c0_54 = arith.constant 0 : index
    %c0_55 = arith.constant 0 : index
    %62 = vector.load %arg13[%c0_53, %c0_54, %c0_55] : memref<2x24x120xf32, #tpu.memory_space<vmem>>, vector<2x24x120xf32>
    tpu.vector_store %arg13[%c0_53, %c0_54, %c0_55], %61 {strides = array<i32>} : memref<2x24x120xf32, #tpu.memory_space<vmem>>, vector<2x24x120xf32>,
    %c0_56 = arith.constant 0 : index
    %c0_57 = arith.constant 0 : index
    %c0_58 = arith.constant 0 : index
    %63 = tpu.strided_load %arg13[%c0_56, %c0_57, %c0_58] {strides = array<i32: 1, 2, 1>} : memref<2x24x120xf32, #tpu.memory_space<vmem>>, vector<2x12x120xf32>
    %c0_59 = arith.constant 0 : index
    %c1_60 = arith.constant 1 : index
    %c0_61 = arith.constant 0 : index
    %64 = tpu.strided_load %arg13[%c0_59, %c1_60, %c0_61] {strides = array<i32: 1, 2, 1>} : memref<2x24x120xf32, #tpu.memory_space<vmem>>, vector<2x12x120xf32>
    %65 = arith.maximumf %63, %64 : vector<2x12x120xf32>
    %cst_62 = arith.constant 0.000000e+00 : f32
    %66 = vector.broadcast %cst_62 : f32 to vector<2x12x120xf32>
    %67 = arith.maximumf %65, %66 : vector<2x12x120xf32>
    %cst_63 = arith.constant 0.000000e+00 : f32
    %68 = vector.broadcast %cst_63 : f32 to vector<16x80xf32>
    %cst_64 = arith.constant 0.000000e+00 : f32
    %69 = vector.broadcast %cst_64 : f32 to vector<16x80xf32>
    %70 = vector.extract_strided_slice %67 {offsets = [0, 0, 0], sizes = [2, 8, 120], strides = [1, 1, 1]} : vector<2x12x120xf32> to vector<2x8x120xf32>
    %71 = vector.shape_cast %70 : vector<2x8x120xf32> to vector<16x120xf32>
    %72 = arith.truncf %71 : vector<16x120xf32> to vector<16x120xbf16>
    %c0_65 = arith.constant 0 : index
    %c0_66 = arith.constant 0 : index
    %c0_67 = arith.constant 0 : index
    %73 = vector.load %arg5[%c0_65, %c0_66, %c0_67] : memref<5x120x80xbf16, #tpu.memory_space<vmem>>, vector<1x120x80xbf16>
    %74 = vector.shape_cast %73 : vector<1x120x80xbf16> to vector<120x80xbf16>
    %cst_68 = arith.constant dense<0.000000e+00> : vector<16x80xf32>
    %75 = tpu.matmul %72, %74, %cst_68 {dimension_numbers = #tpu.dot_dimension_numbers<[1], [0], [0], [1], [0, 0, 1, 1], [], []>} : vector<16x120xbf16>, vector<120x80xbf16>, vector<16x80xf32> -> vector<16x80xf32>
    %76 = arith.addf %68, %75 : vector<16x80xf32>
    %c0_69 = arith.constant 0 : index
    %c0_70 = arith.constant 0 : index
    %c0_71 = arith.constant 0 : index
    %77 = vector.load %arg6[%c0_69, %c0_70, %c0_71] : memref<5x120x80xbf16, #tpu.memory_space<vmem>>, vector<1x120x80xbf16>
    %78 = vector.shape_cast %77 : vector<1x120x80xbf16> to vector<120x80xbf16>
    %cst_72 = arith.constant dense<0.000000e+00> : vector<16x80xf32>
    %79 = tpu.matmul %72, %78, %cst_72 {dimension_numbers = #tpu.dot_dimension_numbers<[1], [0], [0], [1], [0, 0, 1, 1], [], []>} : vector<16x120xbf16>, vector<120x80xbf16>, vector<16x80xf32> -> vector<16x80xf32>
    %80 = arith.addf %69, %79 : vector<16x80xf32>
    %81 = vector.extract_strided_slice %67 {offsets = [0, 1, 0], sizes = [2, 8, 120], strides = [1, 1, 1]} : vector<2x12x120xf32> to vector<2x8x120xf32>
    %82 = vector.shape_cast %81 : vector<2x8x120xf32> to vector<16x120xf32>
    %83 = arith.truncf %82 : vector<16x120xf32> to vector<16x120xbf16>
    %c1_73 = arith.constant 1 : index
    %c0_74 = arith.constant 0 : index
    %c0_75 = arith.constant 0 : index
    %84 = vector.load %arg5[%c1_73, %c0_74, %c0_75] : memref<5x120x80xbf16, #tpu.memory_space<vmem>>, vector<1x120x80xbf16>
    %85 = vector.shape_cast %84 : vector<1x120x80xbf16> to vector<120x80xbf16>
    %cst_76 = arith.constant dense<0.000000e+00> : vector<16x80xf32>
    %86 = tpu.matmul %83, %85, %cst_76 {dimension_numbers = #tpu.dot_dimension_numbers<[1], [0], [0], [1], [0, 0, 1, 1], [], []>} : vector<16x120xbf16>, vector<120x80xbf16>, vector<16x80xf32> -> vector<16x80xf32>
    %87 = arith.addf %76, %86 : vector<16x80xf32>
    %c1_77 = arith.constant 1 : index
    %c0_78 = arith.constant 0 : index
    %c0_79 = arith.constant 0 : index
    %88 = vector.load %arg6[%c1_77, %c0_78, %c0_79] : memref<5x120x80xbf16, #tpu.memory_space<vmem>>, vector<1x120x80xbf16>
    %89 = vector.shape_cast %88 : vector<1x120x80xbf16> to vector<120x80xbf16>
    %cst_80 = arith.constant dense<0.000000e+00> : vector<16x80xf32>
    %90 = tpu.matmul %83, %89, %cst_80 {dimension_numbers = #tpu.dot_dimension_numbers<[1], [0], [0], [1], [0, 0, 1, 1], [], []>} : vector<16x120xbf16>, vector<120x80xbf16>, vector<16x80xf32> -> vector<16x80xf32>
    %91 = arith.addf %80, %90 : vector<16x80xf32>
    %92 = vector.extract_strided_slice %67 {offsets = [0, 2, 0], sizes = [2, 8, 120], strides = [1, 1, 1]} : vector<2x12x120xf32> to vector<2x8x120xf32>
    %93 = vector.shape_cast %92 : vector<2x8x120xf32> to vector<16x120xf32>
    %94 = arith.truncf %93 : vector<16x120xf32> to vector<16x120xbf16>
    %c2_81 = arith.constant 2 : index
    %c0_82 = arith.constant 0 : index
    %c0_83 = arith.constant 0 : index
    %95 = vector.load %arg5[%c2_81, %c0_82, %c0_83] : memref<5x120x80xbf16, #tpu.memory_space<vmem>>, vector<1x120x80xbf16>
    %96 = vector.shape_cast %95 : vector<1x120x80xbf16> to vector<120x80xbf16>
    %cst_84 = arith.constant dense<0.000000e+00> : vector<16x80xf32>
    %97 = tpu.matmul %94, %96, %cst_84 {dimension_numbers = #tpu.dot_dimension_numbers<[1], [0], [0], [1], [0, 0, 1, 1], [], []>} : vector<16x120xbf16>, vector<120x80xbf16>, vector<16x80xf32> -> vector<16x80xf32>
    %98 = arith.addf %87, %97 : vector<16x80xf32>
    %c2_85 = arith.constant 2 : index
    %c0_86 = arith.constant 0 : index
    %c0_87 = arith.constant 0 : index
    %99 = vector.load %arg6[%c2_85, %c0_86, %c0_87] : memref<5x120x80xbf16, #tpu.memory_space<vmem>>, vector<1x120x80xbf16>
    %100 = vector.shape_cast %99 : vector<1x120x80xbf16> to vector<120x80xbf16>
    %cst_88 = arith.constant dense<0.000000e+00> : vector<16x80xf32>
    %101 = tpu.matmul %94, %100, %cst_88 {dimension_numbers = #tpu.dot_dimension_numbers<[1], [0], [0], [1], [0, 0, 1, 1], [], []>} : vector<16x120xbf16>, vector<120x80xbf16>, vector<16x80xf32> -> vector<16x80xf32>
    %102 = arith.addf %91, %101 : vector<16x80xf32>
    %103 = vector.extract_strided_slice %67 {offsets = [0, 3, 0], sizes = [2, 8, 120], strides = [1, 1, 1]} : vector<2x12x120xf32> to vector<2x8x120xf32>
    %104 = vector.shape_cast %103 : vector<2x8x120xf32> to vector<16x120xf32>
    %105 = arith.truncf %104 : vector<16x120xf32> to vector<16x120xbf16>
    %c3_89 = arith.constant 3 : index
    %c0_90 = arith.constant 0 : index
    %c0_91 = arith.constant 0 : index
    %106 = vector.load %arg5[%c3_89, %c0_90, %c0_91] : memref<5x120x80xbf16, #tpu.memory_space<vmem>>, vector<1x120x80xbf16>
    %107 = vector.shape_cast %106 : vector<1x120x80xbf16> to vector<120x80xbf16>
    %cst_92 = arith.constant dense<0.000000e+00> : vector<16x80xf32>
    %108 = tpu.matmul %105, %107, %cst_92 {dimension_numbers = #tpu.dot_dimension_numbers<[1], [0], [0], [1], [0, 0, 1, 1], [], []>} : vector<16x120xbf16>, vector<120x80xbf16>, vector<16x80xf32> -> vector<16x80xf32>
    %109 = arith.addf %98, %108 : vector<16x80xf32>
    %c3_93 = arith.constant 3 : index
    %c0_94 = arith.constant 0 : index
    %c0_95 = arith.constant 0 : index
    %110 = vector.load %arg6[%c3_93, %c0_94, %c0_95] : memref<5x120x80xbf16, #tpu.memory_space<vmem>>, vector<1x120x80xbf16>
    %111 = vector.shape_cast %110 : vector<1x120x80xbf16> to vector<120x80xbf16>
    %cst_96 = arith.constant dense<0.000000e+00> : vector<16x80xf32>
    %112 = tpu.matmul %105, %111, %cst_96 {dimension_numbers = #tpu.dot_dimension_numbers<[1], [0], [0], [1], [0, 0, 1, 1], [], []>} : vector<16x120xbf16>, vector<120x80xbf16>, vector<16x80xf32> -> vector<16x80xf32>
    %113 = arith.addf %102, %112 : vector<16x80xf32>
    %114 = vector.extract_strided_slice %67 {offsets = [0, 4, 0], sizes = [2, 8, 120], strides = [1, 1, 1]} : vector<2x12x120xf32> to vector<2x8x120xf32>
    %115 = vector.shape_cast %114 : vector<2x8x120xf32> to vector<16x120xf32>
    %116 = arith.truncf %115 : vector<16x120xf32> to vector<16x120xbf16>
    %c4_97 = arith.constant 4 : index
    %c0_98 = arith.constant 0 : index
    %c0_99 = arith.constant 0 : index
    %117 = vector.load %arg5[%c4_97, %c0_98, %c0_99] : memref<5x120x80xbf16, #tpu.memory_space<vmem>>, vector<1x120x80xbf16>
    %118 = vector.shape_cast %117 : vector<1x120x80xbf16> to vector<120x80xbf16>
    %cst_100 = arith.constant dense<0.000000e+00> : vector<16x80xf32>
    %119 = tpu.matmul %116, %118, %cst_100 {dimension_numbers = #tpu.dot_dimension_numbers<[1], [0], [0], [1], [0, 0, 1, 1], [], []>} : vector<16x120xbf16>, vector<120x80xbf16>, vector<16x80xf32> -> vector<16x80xf32>
    %120 = arith.addf %109, %119 : vector<16x80xf32>
    %c4_101 = arith.constant 4 : index
    %c0_102 = arith.constant 0 : index
    %c0_103 = arith.constant 0 : index
    %121 = vector.load %arg6[%c4_101, %c0_102, %c0_103] : memref<5x120x80xbf16, #tpu.memory_space<vmem>>, vector<1x120x80xbf16>
    %122 = vector.shape_cast %121 : vector<1x120x80xbf16> to vector<120x80xbf16>
    %cst_104 = arith.constant dense<0.000000e+00> : vector<16x80xf32>
    %123 = tpu.matmul %116, %122, %cst_104 {dimension_numbers = #tpu.dot_dimension_numbers<[1], [0], [0], [1], [0, 0, 1, 1], [], []>} : vector<16x120xbf16>, vector<120x80xbf16>, vector<16x80xf32> -> vector<16x80xf32>
    %124 = arith.addf %113, %123 : vector<16x80xf32>
    %125 = arith.maximumf %120, %124 : vector<16x80xf32>
    %c0_105 = arith.constant 0 : index
    %c0_106 = arith.constant 0 : index
    %126 = vector.load %arg7[%c0_105, %c0_106] : memref<1x80xf32, #tpu.memory_space<vmem>>, vector<1x80xf32>
    %127 = vector.broadcast %126 : vector<1x80xf32> to vector<16x80xf32>
    %128 = arith.addf %125, %127 : vector<16x80xf32>
    %129 = vector.shape_cast %128 : vector<16x80xf32> to vector<2x8x80xf32>
    %c0_107 = arith.constant 0 : index
    %c0_108 = arith.constant 0 : index
    %c0_109 = arith.constant 0 : index
    %130 = vector.load %arg14[%c0_107, %c0_108, %c0_109] : memref<2x8x80xf32, #tpu.memory_space<vmem>>, vector<2x8x80xf32>
    tpu.vector_store %arg14[%c0_107, %c0_108, %c0_109], %129 {strides = array<i32>} : memref<2x8x80xf32, #tpu.memory_space<vmem>>, vector<2x8x80xf32>,
    %c0_110 = arith.constant 0 : index
    %c0_111 = arith.constant 0 : index
    %c0_112 = arith.constant 0 : index
    %131 = tpu.strided_load %arg14[%c0_110, %c0_111, %c0_112] {strides = array<i32: 1, 2, 1>} : memref<2x8x80xf32, #tpu.memory_space<vmem>>, vector<2x4x80xf32>
    %c0_113 = arith.constant 0 : index
    %c1_114 = arith.constant 1 : index
    %c0_115 = arith.constant 0 : index
    %132 = tpu.strided_load %arg14[%c0_113, %c1_114, %c0_115] {strides = array<i32: 1, 2, 1>} : memref<2x8x80xf32, #tpu.memory_space<vmem>>, vector<2x4x80xf32>
    %133 = arith.maximumf %131, %132 : vector<2x4x80xf32>
    %cst_116 = arith.constant 0.000000e+00 : f32
    %134 = vector.broadcast %cst_116 : f32 to vector<2x4x80xf32>
    %135 = arith.maximumf %133, %134 : vector<2x4x80xf32>
    %cst_117 = arith.constant 0.000000e+00 : f32
    %136 = vector.broadcast %cst_117 : f32 to vector<2x50xf32>
    %137 = vector.extract_strided_slice %135 {offsets = [0, 0, 0], sizes = [2, 1, 80], strides = [1, 1, 1]} : vector<2x4x80xf32> to vector<2x1x80xf32>
    %138 = vector.shape_cast %137 : vector<2x1x80xf32> to vector<2x80xf32>
    %139 = arith.truncf %138 : vector<2x80xf32> to vector<2x80xbf16>
    %c0_118 = arith.constant 0 : index
    %c0_119 = arith.constant 0 : index
    %c0_120 = arith.constant 0 : index
    %140 = vector.load %arg8[%c0_118, %c0_119, %c0_120] : memref<4x80x50xbf16, #tpu.memory_space<vmem>>, vector<1x80x50xbf16>
    %141 = vector.shape_cast %140 : vector<1x80x50xbf16> to vector<80x50xbf16>
    %cst_121 = arith.constant dense<0.000000e+00> : vector<2x50xf32>
    %142 = tpu.matmul %139, %141, %cst_121 {dimension_numbers = #tpu.dot_dimension_numbers<[1], [0], [0], [1], [0, 0, 1, 1], [], []>} : vector<2x80xbf16>, vector<80x50xbf16>, vector<2x50xf32> -> vector<2x50xf32>
    %143 = arith.addf %136, %142 : vector<2x50xf32>
    %144 = vector.extract_strided_slice %135 {offsets = [0, 1, 0], sizes = [2, 1, 80], strides = [1, 1, 1]} : vector<2x4x80xf32> to vector<2x1x80xf32>
    %145 = vector.shape_cast %144 : vector<2x1x80xf32> to vector<2x80xf32>
    %146 = arith.truncf %145 : vector<2x80xf32> to vector<2x80xbf16>
    %c1_122 = arith.constant 1 : index
    %c0_123 = arith.constant 0 : index
    %c0_124 = arith.constant 0 : index
    %147 = vector.load %arg8[%c1_122, %c0_123, %c0_124] : memref<4x80x50xbf16, #tpu.memory_space<vmem>>, vector<1x80x50xbf16>
    %148 = vector.shape_cast %147 : vector<1x80x50xbf16> to vector<80x50xbf16>
    %cst_125 = arith.constant dense<0.000000e+00> : vector<2x50xf32>
    %149 = tpu.matmul %146, %148, %cst_125 {dimension_numbers = #tpu.dot_dimension_numbers<[1], [0], [0], [1], [0, 0, 1, 1], [], []>} : vector<2x80xbf16>, vector<80x50xbf16>, vector<2x50xf32> -> vector<2x50xf32>
    %150 = arith.addf %143, %149 : vector<2x50xf32>
    %151 = vector.extract_strided_slice %135 {offsets = [0, 2, 0], sizes = [2, 1, 80], strides = [1, 1, 1]} : vector<2x4x80xf32> to vector<2x1x80xf32>
    %152 = vector.shape_cast %151 : vector<2x1x80xf32> to vector<2x80xf32>
    %153 = arith.truncf %152 : vector<2x80xf32> to vector<2x80xbf16>
    %c2_126 = arith.constant 2 : index
    %c0_127 = arith.constant 0 : index
    %c0_128 = arith.constant 0 : index
    %154 = vector.load %arg8[%c2_126, %c0_127, %c0_128] : memref<4x80x50xbf16, #tpu.memory_space<vmem>>, vector<1x80x50xbf16>
    %155 = vector.shape_cast %154 : vector<1x80x50xbf16> to vector<80x50xbf16>
    %cst_129 = arith.constant dense<0.000000e+00> : vector<2x50xf32>
    %156 = tpu.matmul %153, %155, %cst_129 {dimension_numbers = #tpu.dot_dimension_numbers<[1], [0], [0], [1], [0, 0, 1, 1], [], []>} : vector<2x80xbf16>, vector<80x50xbf16>, vector<2x50xf32> -> vector<2x50xf32>
    %157 = arith.addf %150, %156 : vector<2x50xf32>
    %158 = vector.extract_strided_slice %135 {offsets = [0, 3, 0], sizes = [2, 1, 80], strides = [1, 1, 1]} : vector<2x4x80xf32> to vector<2x1x80xf32>
    %159 = vector.shape_cast %158 : vector<2x1x80xf32> to vector<2x80xf32>
    %160 = arith.truncf %159 : vector<2x80xf32> to vector<2x80xbf16>
    %c3_130 = arith.constant 3 : index
    %c0_131 = arith.constant 0 : index
    %c0_132 = arith.constant 0 : index
    %161 = vector.load %arg8[%c3_130, %c0_131, %c0_132] : memref<4x80x50xbf16, #tpu.memory_space<vmem>>, vector<1x80x50xbf16>
    %162 = vector.shape_cast %161 : vector<1x80x50xbf16> to vector<80x50xbf16>
    %cst_133 = arith.constant dense<0.000000e+00> : vector<2x50xf32>
    %163 = tpu.matmul %160, %162, %cst_133 {dimension_numbers = #tpu.dot_dimension_numbers<[1], [0], [0], [1], [0, 0, 1, 1], [], []>} : vector<2x80xbf16>, vector<80x50xbf16>, vector<2x50xf32> -> vector<2x50xf32>
    %164 = arith.addf %157, %163 : vector<2x50xf32>
    %c0_134 = arith.constant 0 : index
    %c0_135 = arith.constant 0 : index
    %165 = vector.load %arg9[%c0_134, %c0_135] : memref<1x50xf32, #tpu.memory_space<vmem>>, vector<1x50xf32>
    %166 = vector.broadcast %165 : vector<1x50xf32> to vector<2x50xf32>
    %167 = arith.addf %164, %166 : vector<2x50xf32>
    %cst_136 = arith.constant 0.000000e+00 : f32
    %168 = vector.broadcast %cst_136 : f32 to vector<2x50xf32>
    %169 = arith.maximumf %167, %168 : vector<2x50xf32>
    %170 = arith.truncf %169 : vector<2x50xf32> to vector<2x50xbf16>
    %c0_137 = arith.constant 0 : index
    %c0_138 = arith.constant 0 : index
    %171 = vector.load %arg10[%c0_137, %c0_138] : memref<50x10xbf16, #tpu.memory_space<vmem>>, vector<50x10xbf16>
    %cst_139 = arith.constant dense<0.000000e+00> : vector<2x10xf32>
    %172 = tpu.matmul %170, %171, %cst_139 {dimension_numbers = #tpu.dot_dimension_numbers<[1], [0], [0], [1], [0, 0, 1, 1], [], []>} : vector<2x50xbf16>, vector<50x10xbf16>, vector<2x10xf32> -> vector<2x10xf32>
    %c0_140 = arith.constant 0 : index
    %c0_141 = arith.constant 0 : index
    %173 = vector.load %arg11[%c0_140, %c0_141] : memref<1x10xf32, #tpu.memory_space<vmem>>, vector<1x10xf32>
    %174 = vector.broadcast %173 : vector<1x10xf32> to vector<2x10xf32>
    %175 = arith.addf %172, %174 : vector<2x10xf32>
    %cst_142 = arith.constant dense<0xFF800000> : vector<2xf32>
    %176 = vector.multi_reduction <maximumf>, %175, %cst_142 [1] : vector<2x10xf32> to vector<2xf32>
    %177 = vector.shape_cast %176 : vector<2xf32> to vector<2x1xf32>
    %178 = vector.broadcast %177 : vector<2x1xf32> to vector<2x10xf32>
    %179 = arith.subf %175, %178 : vector<2x10xf32>
    %180 = math.exp %179 : vector<2x10xf32>
    %cst_143 = arith.constant dense<0.000000e+00> : vector<2xf32>
    %181 = vector.multi_reduction <add>, %180, %cst_143 [1] : vector<2x10xf32> to vector<2xf32>
    %182 = vector.shape_cast %181 : vector<2xf32> to vector<2x1xf32>
    %183 = tpu.reciprocal %182 {approx = true} : vector<2x1xf32> -> vector<2x1xf32>
    %184 = arith.mulf %182, %183 : vector<2x1xf32>
    %cst_144 = arith.constant 2.000000e+00 : f32
    %185 = vector.broadcast %cst_144 : f32 to vector<2x1xf32>
    %186 = arith.subf %185, %184 : vector<2x1xf32>
    %187 = arith.mulf %183, %186 : vector<2x1xf32>
    %188 = vector.broadcast %187 : vector<2x1xf32> to vector<2x10xf32>
    %189 = arith.mulf %180, %188 : vector<2x10xf32>
    %c0_145 = arith.constant 0 : index
    %c0_146 = arith.constant 0 : index
    %190 = vector.load %arg12[%c0_145, %c0_146] : memref<2x10xf32, #tpu.memory_space<vmem>>, vector<2x10xf32>
    tpu.vector_store %arg12[%c0_145, %c0_146], %189 {strides = array<i32>} : memref<2x10xf32, #tpu.memory_space<vmem>>, vector<2x10xf32>,
    return
  }
  func.func @transform_0(%arg0: i32) -> (i32, i32, i32) {
    %c0_i32 = arith.constant 0 : i32
    %c0_i32_0 = arith.constant 0 : i32
    %c0_i32_1 = arith.constant 0 : i32
    return %arg0, %c0_i32, %c0_i32_0 : i32, i32, i32
  }
  func.func @transform_1(%arg0: i32) -> (i32, i32, i32) {
    %c0_i32 = arith.constant 0 : i32
    %c0_i32_0 = arith.constant 0 : i32
    %c0_i32_1 = arith.constant 0 : i32
    %c0_i32_2 = arith.constant 0 : i32
    return %c0_i32, %c0_i32_0, %c0_i32_1 : i32, i32, i32
  }
  func.func @transform_2(%arg0: i32) -> (i32, i32, i32) {
    %c0_i32 = arith.constant 0 : i32
    %c0_i32_0 = arith.constant 0 : i32
    %c0_i32_1 = arith.constant 0 : i32
    %c0_i32_2 = arith.constant 0 : i32
    return %c0_i32, %c0_i32_0, %c0_i32_1 : i32, i32, i32
  }
  func.func @transform_3(%arg0: i32) -> (i32, i32) {
    %c0_i32 = arith.constant 0 : i32
    %c0_i32_0 = arith.constant 0 : i32
    %c0_i32_1 = arith.constant 0 : i32
    return %c0_i32, %c0_i32_0 : i32, i32
  }
  func.func @transform_4(%arg0: i32) -> (i32, i32, i32) {
    %c0_i32 = arith.constant 0 : i32
    %c0_i32_0 = arith.constant 0 : i32
    %c0_i32_1 = arith.constant 0 : i32
    %c0_i32_2 = arith.constant 0 : i32
    return %c0_i32, %c0_i32_0, %c0_i32_1 : i32, i32, i32
  }
  func.func @transform_5(%arg0: i32) -> (i32, i32, i32) {
    %c0_i32 = arith.constant 0 : i32
    %c0_i32_0 = arith.constant 0 : i32
    %c0_i32_1 = arith.constant 0 : i32
    %c0_i32_2 = arith.constant 0 : i32
    return %c0_i32, %c0_i32_0, %c0_i32_1 : i32, i32, i32
  }
  func.func @transform_6(%arg0: i32) -> (i32, i32) {
    %c0_i32 = arith.constant 0 : i32
    %c0_i32_0 = arith.constant 0 : i32
    %c0_i32_1 = arith.constant 0 : i32
    return %c0_i32, %c0_i32_0 : i32, i32
  }
  func.func @transform_7(%arg0: i32) -> (i32, i32, i32) {
    %c0_i32 = arith.constant 0 : i32
    %c0_i32_0 = arith.constant 0 : i32
    %c0_i32_1 = arith.constant 0 : i32
    %c0_i32_2 = arith.constant 0 : i32
    return %c0_i32, %c0_i32_0, %c0_i32_1 : i32, i32, i32
  }
  func.func @transform_8(%arg0: i32) -> (i32, i32) {
    %c0_i32 = arith.constant 0 : i32
    %c0_i32_0 = arith.constant 0 : i32
    %c0_i32_1 = arith.constant 0 : i32
    return %c0_i32, %c0_i32_0 : i32, i32
  }
  func.func @transform_9(%arg0: i32) -> (i32, i32) {
    %c0_i32 = arith.constant 0 : i32
    %c0_i32_0 = arith.constant 0 : i32
    %c0_i32_1 = arith.constant 0 : i32
    return %c0_i32, %c0_i32_0 : i32, i32
  }
  func.func @transform_10(%arg0: i32) -> (i32, i32) {
    %c0_i32 = arith.constant 0 : i32
    %c0_i32_0 = arith.constant 0 : i32
    %c0_i32_1 = arith.constant 0 : i32
    return %c0_i32, %c0_i32_0 : i32, i32
  }
  func.func @transform_11(%arg0: i32) -> (i32, i32) {
    %c0_i32 = arith.constant 0 : i32
    %c0_i32_0 = arith.constant 0 : i32
    return %arg0, %c0_i32 : i32, i32
  }
}

</mosaic_0001>

<bundles_post_ra>
// kernel: tpu_custom_call.1
= control target key start
LH: loop header
LB: loop body
LE: loop exit
PB: predicated region body
PF: predicated region fallthrough
CT: control target
= control target key end

     0   :  { %vm92_vm0 = vcmask 1045504   ;;  %vm82_vm1 = vcmask 228352   ;;  %s3447_s0 = inlined_call_operand.vmem [shape: f32[2,28,28], index: 0, kind: input, shape index: {}]   ;;  %s3448_s1 = inlined_call_operand.vmem [shape: bf16[5,28,120], index: 1, kind: input, shape index: {}]   ;;  %s3449_s2 = inlined_call_operand.vmem [shape: bf16[5,28,120], index: 2, kind: input, shape index: {}]   ;;  %s3450_s3 = inlined_call_operand.vmem [shape: f32[1,120], index: 3, kind: input, shape index: {}]   ;;  %s3451_s4 = inlined_call_operand.vmem [shape: bf16[5,120,80], index: 4, kind: input, shape index: {}]   ;;  %s3452_s5 = inlined_call_operand.vmem [shape: bf16[5,120,80], index: 5, kind: input, shape index: {}]   ;;  %s3453_s6 = inlined_call_operand.vmem [shape: f32[1,80], index: 6, kind: input, shape index: {}]   ;;  %s3454_s7 = inlined_call_operand.vmem [shape: bf16[4,80,50], index: 7, kind: input, shape index: {}]   ;;  %s3455_s8 = inlined_call_operand.vmem [shape: f32[1,50], index: 8, kind: input, shape index: {}]   ;;  %s3456_s9 = inlined_call_operand.vmem [shape: bf16[50,10], index: 9, kind: input, shape index: {}]   ;;  %s3457_s10 = inlined_call_operand.vmem [shape: f32[1,10], index: 10, kind: input, shape index: {}]   ;;  %s3458_s11 = inlined_call_operand.hbm [shape: f32[2,10], index: 11, kind: output, shape index: {}]  }
   0x1   :  { %v1865_v0 = vld [vmem:[%s3448_s1 + $0x18] sm:$0xf]  ;;  %v2539_v1 = vld [vmem:[%s3448_s1 + $0x18] sm:$0x30]  ;;  %v1876_v3 = vld [vmem:[%s3448_s1 + $0x8] sm:$0xf] }
   0x2   :  { %v1866_v2 = vor.u32 %v2539_v1, %v1865_v0  ;;  %v2535_v4 = vld [vmem:[%s3448_s1 + $0x8] sm:$0x30]  ;;  %v1891_v5 = vld [vmem:[%s3449_s2 + $0x18] sm:$0xf]  ;;  %v2541_v7 = vld [vmem:[%s3449_s2 + $0x18] sm:$0x30] }
   0x3   :  { %v1877_v6 = vor.u32 %v2535_v4, %v1876_v3  ;;  %v1902_v8 = vld [vmem:[%s3449_s2 + $0x8] sm:$0xf]  ;;  %v2537_v9 = vld [vmem:[%s3449_s2 + $0x8] sm:$0x30]  ;;  %v1892_v11 = vor.u32 %v2541_v7, %v1891_v5  ;;  %v2538_v13 = vld [vmem:[%s3448_s1 + $0x10] sm:$0xff] }
   0x4   :  { %v94_v10 = vsel %vm92_vm0, %v1866_v2, 0  ;;  %v1903_v12 = vor.u32 %v2537_v9, %v1902_v8  ;;  %v2534_v14 = vld [vmem:[%s3448_s1] sm:$0xff]  ;;  %v2540_v16 = vld [vmem:[%s3449_s2 + $0x10] sm:$0xff]  ;;  %v41_v23 = vld [vmem:[%s3447_s0 + $0x8] sm:$0xff] }
   0x5   :  { %102 = vmatpush.bf16.msra.mxu0 %v94_v10  ;;  %v141_v15 = vsel %vm92_vm0, %v1877_v6, 0  ;;  %v2536_v17 = vld [vmem:[%s3449_s2] sm:$0xff]  ;;  %v58_v19 = vld [vmem:[%s3447_s0 + $0x9] sm:$0xff]  ;;  %v184_v20 = vsel %vm92_vm0, %v1892_v11, 0 }
   0x6   :  { %v57_v18 = vld [vmem:[%s3447_s0 + $0x1] sm:$0xff]  ;;  %149 = vmatpush.bf16.msra.mxu1 %v141_v15  ;;  %v222_v21 = vsel %vm92_vm0, %v1903_v12, 0  ;;  %192 = vmatpush.bf16.msra.mxu2 %v184_v20  ;;  %v2543_v25 = vld [vmem:[%s3448_s1 + $0x28] sm:$0x30] }
   0x7   :  { %v40_v22 = vld [vmem:[%s3447_s0] sm:$0xff]  ;;  %v1917_v24 = vld [vmem:[%s3448_s1 + $0x28] sm:$0xf]  ;;  %230 = vmatpush.bf16.msra.mxu3 %v222_v21  ;;  %v2545_v27 = vld [vmem:[%s3449_s2 + $0x28] sm:$0x30]  ;;  %v63_v28 = vpack.c.bf16 %v58_v19, %v57_v18 }
   0x8   :  { %v1932_v26 = vld [vmem:[%s3449_s2 + $0x28] sm:$0xf]  ;;  %v1918_v29 = vor.u32 %v2543_v25, %v1917_v24  ;;  %v46_v31 = vpack.c.bf16 %v41_v23, %v40_v22  ;;  %v2544_v34 = vld [vmem:[%s3449_s2 + $0x20] sm:$0xff] }
   0x9   :  { %v1933_v30 = vor.u32 %v2545_v27, %v1932_v26  ;;  %103 = vmatpush.bf16.msra.mxu0 %v2538_v13 }
   0xa   :  { %150 = vmatpush.bf16.msra.mxu1 %v2534_v14  ;;  %v283_v32 = vsel %vm92_vm0, %v1918_v29, 0  ;;  %193 = vmatpush.bf16.msra.mxu2 %v2540_v16 }
   0xb   :  { %v332_v33 = vsel %vm92_vm0, %v1933_v30, 0  ;;  %231 = vmatpush.bf16.msra.mxu3 %v2536_v17 }
   0xc   :  { %1867 = vmatmul.msk.bf16.vlgmr.msra.gmra.mxu0 %vm82_vm1, %v63_v28 }
   0xe   :  { %340 = vmatpush.bf16.msrb.mxu1 %v332_v33 }
   0xf   :  { %16 = vsyncpa [#allocation5], 0  ;;  %1878 = vmatmul.msk.bf16.vlgmr.msra.gmra.mxu1 %vm82_vm1, %v46_v31  ;;  %291 = vmatpush.bf16.msrb.mxu0 %v283_v32  ;;  %v2542_v35 = vld [vmem:[%s3448_s1 + $0x20] sm:$0xff]  ;;  %v1947_v36 = vld [vmem:[%s3448_s1 + $0x38] sm:$0xf]  ;;  %vm751_vm2 = vcmask 1043456  }
  0x10   :  { %1893 = vmatmul.msk.bf16.vlgmr.msra.gmra.mxu2 %vm82_vm1, %v63_v28  ;;  %1904 = vmatmul.msk.bf16.vlgmr.msra.gmra.mxu3 %vm82_vm1, %v46_v31  ;;  %v2547_v37 = vld [vmem:[%s3448_s1 + $0x38] sm:$0x30]  ;;  %v1962_v38 = vld [vmem:[%s3449_s2 + $0x38] sm:$0xf]  ;;  %v2546_v44 = vld [vmem:[%s3448_s1 + $0x30] sm:$0xff]  ;;  %vm612_vm3 = vcmask 982016  }
  0x11   :  { %v1948_v39 = vor.u32 %v2547_v37, %v1947_v36  ;;  %v2549_v40 = vld [vmem:[%s3449_s2 + $0x38] sm:$0x30]  ;;  %v2548_v45 = vld [vmem:[%s3449_s2 + $0x30] sm:$0xff]  ;;  %v60_v47 = vld [vmem:[%s3447_s0 + $0x21] sm:$0xff]  ;;  %vm677_vm4 = vcmask 1046528   ;;  %vm1146_vm5 = vcmask 1044480  }
  0x12   :  { %341 = vmatpush.bf16.msrb.mxu1 %v2544_v34  ;;  %v1963_v41 = vor.u32 %v2549_v40, %v1962_v38  ;;  %v59_v46 = vld [vmem:[%s3447_s0 + $0x11] sm:$0xff]  ;;  %v43_v49 = vld [vmem:[%s3447_s0 + $0x20] sm:$0xff]  ;;  %v1977_v52 = vld [vmem:[%s3448_s1 + $0x48] sm:$0xf]  ;;  %vm1499_vm6 = vcmask 654336   ;;  %vm1541_vm7 = vcmask 1041409  }
  0x13   :  { %292 = vmatpush.bf16.msrb.mxu0 %v2542_v35  ;;  %v399_v42 = vsel %vm92_vm0, %v1948_v39, 0  ;;  %v42_v48 = vld [vmem:[%s3447_s0 + $0x10] sm:$0xff]  ;;  %v64_v50 = vpack.c.bf16 %v60_v47, %v59_v46  ;;  %v2551_v53 = vld [vmem:[%s3448_s1 + $0x48] sm:$0x30]  ;;  %v1992_v54 = vld [vmem:[%s3449_s2 + $0x48] sm:$0xf] }
  0x14   :  { %407 = vmatpush.bf16.msrb.mxu2 %v399_v42  ;;  %v448_v43 = vsel %vm92_vm0, %v1963_v41, 0  ;;  %v47_v51 = vpack.c.bf16 %v43_v49, %v42_v48  ;;  %v1978_v55 = vor.u32 %v2551_v53, %v1977_v52  ;;  %v2553_v56 = vld [vmem:[%s3449_s2 + $0x48] sm:$0x30]  ;;  %v62_v61 = vld [vmem:[%s3447_s0 + $0x31] sm:$0xff]  ;;  %v2550_v2 = vld [vmem:[%s3448_s1 + $0x40] sm:$0xff]  ;;  %vm1806_vm8 = vcmask 1040384  }
  0x15   :  { %456 = vmatpush.bf16.msrb.mxu3 %v448_v43  ;;  %v1993_v57 = vor.u32 %v2553_v56, %v1992_v54  ;;  %v61_v60 = vld [vmem:[%s3447_s0 + $0x29] sm:$0xff]  ;;  %v2552_v3 = vld [vmem:[%s3449_s2 + $0x40] sm:$0xff]  ;;  %v250_v10 = vld [vmem:[%s3447_s0 + $0x12] sm:$0xff]  ;;  %vm1802_vm9 = vcmask 408576   ;;  %vm1823_vm10 = vcmask 74752   ;;  %s1846_s23 = sshll.u32 %s3458_s11, 4  ;;  %s1847_s23 = int_to_ptr.hbm [resolvable:$true] %s1846_s23 }
  0x16   :  { %v515_v58 = vsel %vm92_vm0, %v1978_v55, 0  ;;  %v44_v62 = vld [vmem:[%s3447_s0 + $0x28] sm:$0xff]  ;;  %v45_v63 = vld [vmem:[%s3447_s0 + $0x30] sm:$0xff]  ;;  %v65_v0 = vpack.c.bf16 %v62_v61, %v61_v60 }
  0x17   :  { %523 = vmatpush.bf16.msra.mxu0 %v515_v58  ;;  %v564_v59 = vsel %vm92_vm0, %v1993_v57, 0  ;;  %v48_v1 = vpack.c.bf16 %v45_v63, %v44_v62  ;;  %v248_v4 = vld [vmem:[%s3447_s0 + $0x2] sm:$0xff]  ;;  %v249_v5 = vld [vmem:[%s3447_s0 + $0xa] sm:$0xff]  ;;  %v366_v12 = vld [vmem:[%s3447_s0 + $0x13] sm:$0xff] }
  0x18   :  { %408 = vmatpush.bf16.msrb.mxu2 %v2546_v44  ;;  %572 = vmatpush.bf16.msra.mxu1 %v564_v59  ;;  %v364_v6 = vld [vmem:[%s3447_s0 + $0x3] sm:$0xff]  ;;  %v365_v7 = vld [vmem:[%s3447_s0 + $0xb] sm:$0xff]  ;;  %v254_v8 = vpack.c.bf16 %v249_v5, %v248_v4  ;;  %v369_v19 = vld [vmem:[%s3447_s0 + $0x33] sm:$0xff] }
  0x19   :  { %457 = vmatpush.bf16.msrb.mxu3 %v2548_v45  ;;  %v370_v9 = vpack.c.bf16 %v365_v7, %v364_v6  ;;  %v251_v11 = vld [vmem:[%s3447_s0 + $0x22] sm:$0xff]  ;;  %v252_v16 = vld [vmem:[%s3447_s0 + $0x2a] sm:$0xff]  ;;  %v253_v17 = vld [vmem:[%s3447_s0 + $0x32] sm:$0xff] }
  0x1a   :  { %v367_v13 = vld [vmem:[%s3447_s0 + $0x23] sm:$0xff]  ;;  %v255_v14 = vpack.c.bf16 %v251_v11, %v250_v10  ;;  %v368_v18 = vld [vmem:[%s3447_s0 + $0x2b] sm:$0xff]  ;;  %v256_v20 = vpack.c.bf16 %v253_v17, %v252_v16  ;;  %v482_v25 = vld [vmem:[%s3447_s0 + $0x14] sm:$0xff] }
  0x1b   :  { %524 = vmatpush.bf16.msra.mxu0 %v2550_v2  ;;  %v371_v15 = vpack.c.bf16 %v367_v13, %v366_v12  ;;  %v372_v21 = vpack.c.bf16 %v369_v19, %v368_v18  ;;  %v480_v22 = vld [vmem:[%s3447_s0 + $0x4] sm:$0xff]  ;;  %v481_v23 = vld [vmem:[%s3447_s0 + $0xc] sm:$0xff]  ;;  %v485_v29 = vld [vmem:[%s3447_s0 + $0x34] sm:$0xff] }
  0x1c   :  { %1868 = vmatmul.msk.bf16.gmra.mxu0 %vm82_vm1, %v64_v50  ;;  %573 = vmatpush.bf16.msra.mxu1 %v2552_v3  ;;  %v486_v24 = vpack.c.bf16 %v481_v23, %v480_v22  ;;  %v483_v26 = vld [vmem:[%s3447_s0 + $0x24] sm:$0xff]  ;;  %v484_v28 = vld [vmem:[%s3447_s0 + $0x2c] sm:$0xff]  ;;  %v657_v59 = vld [vmem:[%s3451_s4 + $0x38] sm:$0xf] }
  0x1d   :  { %v487_v27 = vpack.c.bf16 %v483_v26, %v482_v25  ;;  %v488_v30 = vpack.c.bf16 %v485_v29, %v484_v28  ;;  %v798_v62 = vunpack.c.l.b16 %v657_v59  ;;  %v2560_v3 = vld [vmem:[%s3451_s4 + $0x30] sm:$0xff]  ;;  %v2559_v7 = vld [vmem:[%s3451_s4 + $0x28] sm:$0xff]  ;;  %v2558_v13 = vld [vmem:[%s3451_s4 + $0x20] sm:$0xff] }
  0x1e   :  { %v2011_v6 = vld [vmem:[%s3451_s4 + $0x74] sm:$0xf]  ;;  %v2574_v16 = vld [vmem:[%s3451_s4 + $0x6c] sm:$0xff]  ;;  %v2557_v17 = vld [vmem:[%s3451_s4 + $0x18] sm:$0xff] }
  0x1f   :  { %1879 = vmatmul.msk.bf16.gmra.mxu1 %vm82_vm1, %v47_v51  ;;  %v806_v63 = vpack.c.b16 %v798_v62, %v798_v62  ;;  %v2573_v18 = vld [vmem:[%s3451_s4 + $0x64] sm:$0xff]  ;;  %v2556_v19 = vld [vmem:[%s3451_s4 + $0x10] sm:$0xff]  ;;  %v2572_v28 = vld [vmem:[%s3451_s4 + $0x5c] sm:$0xff] }
  0x20   :  { %1894 = vmatmul.msk.bf16.gmra.mxu2 %vm82_vm1, %v64_v50  ;;  %1905 = vmatmul.msk.bf16.gmra.mxu3 %vm82_vm1, %v47_v51 }
  0x2c   :  { %1869 = vmatmul.msk.bf16.gmra.mxu0 %vm82_vm1, %v65_v0 }
  0x2f   :  { %1880 = vmatmul.msk.bf16.gmra.mxu1 %vm82_vm1, %v48_v1 }
  0x30   :  { %1895 = vmatmul.msk.bf16.gmra.mxu2 %vm82_vm1, %v65_v0  ;;  %1906 = vmatmul.msk.bf16.gmra.mxu3 %vm82_vm1, %v48_v1  ;;  %v818_v0 = vsel %vm751_vm2, %v806_v63, 0  ;;  %v2570_v63 = vld [vmem:[%s3451_s4 + $0x4c] sm:$0xff] }
  0x31   :  { %820 = vmatpush.bf16.msra.mxu3 %v818_v0 }
  0x35   :  { %821 = vmatpush.bf16.msra.mxu3 %v2560_v3 }
  0x39   :  { %822 = vmatpush.bf16.msra.mxu3 %v2559_v7 }
  0x3c   :  { %1919 = vmatmul.msk.bf16.vlgmr.msrb.gmra.mxu0 %vm82_vm1, %v254_v8 }
  0x3d   :  { %823 = vmatpush.bf16.msra.mxu3 %v2558_v13 }
  0x3f   :  { %1934 = vmatmul.msk.bf16.vlgmr.msrb.gmra.mxu1 %vm82_vm1, %v254_v8  ;;  %v732_v8 = vunpack.c.l.b16 %v2011_v6  ;;  %v2587_v6 = vld [vmem:[%s3451_s4 + $0xa0] sm:$0xff] }
  0x40   :  { %1949 = vmatmul.msk.bf16.vlgmr.msrb.gmra.mxu2 %vm82_vm1, %v370_v9  ;;  %1964 = vmatmul.msk.bf16.vlgmr.msrb.gmra.mxu3 %vm82_vm1, %v370_v9 }
  0x41   :  { %v740_v9 = vpack.c.b16 %v732_v8, %v732_v8  ;;  %824 = vmatpush.bf16.msra.mxu3 %v2557_v17  ;;  %v2593_v17 = vld [vmem:[%s3452_s5 + $0x98] sm:$0xff] }
  0x43   :  { %v753_v12 = vsel %vm751_vm2, %v740_v9, 0  ;;  %v2569_v9 = vld [vmem:[%s3451_s4 + $0x44] sm:$0xff] }
  0x44   :  { %755 = vmatpush.bf16.msra.mxu2 %v753_v12 }
  0x45   :  { %825 = vmatpush.bf16.msra.mxu3 %v2556_v19 }
  0x48   :  { %756 = vmatpush.bf16.msra.mxu2 %v2574_v16  ;;  %v2586_v16 = vld [vmem:[%s3451_s4 + $0x98] sm:$0xff] }
  0x4c   :  { %1920 = vmatmul.msk.bf16.gmra.mxu0 %vm82_vm1, %v255_v14  ;;  %757 = vmatpush.bf16.msra.mxu2 %v2573_v18  ;;  %v2566_v18 = vld [vmem:[%s3452_s5 + $0x28] sm:$0xff] }
  0x4f   :  { %1935 = vmatmul.msk.bf16.gmra.mxu1 %vm82_vm1, %v255_v14 }
  0x50   :  { %1950 = vmatmul.msk.bf16.gmra.mxu2 %vm82_vm1, %v371_v15  ;;  %1965 = vmatmul.msk.bf16.gmra.mxu3 %vm82_vm1, %v371_v15 }
  0x51   :  { %758 = vmatpush.bf16.msra.mxu2 %v2572_v28 }
  0x5c   :  { %1921 = vmatmul.msk.bf16.gmra.mxu0 %vm82_vm1, %v256_v20 }
  0x5f   :  { %1936 = vmatmul.msk.bf16.gmra.mxu1 %vm82_vm1, %v256_v20  ;;  %v2157_v20 = vld [vmem:[%s3451_s4 + $0xb0] sm:$0xf] }
  0x60   :  { %1951 = vmatmul.msk.bf16.gmra.mxu2 %vm82_vm1, %v372_v21  ;;  %1966 = vmatmul.msk.bf16.gmra.mxu3 %vm82_vm1, %v372_v21  ;;  %v2201_v21 = vld [vmem:[%s3452_s5 + $0xb0] sm:$0xf] }
  0x61   :  { %v1111_v25 = vunpack.c.l.b16 %v2201_v21 }
  0x6c   :  { %1979 = vmatmul.msk.bf16.vlgmr.msra.gmra.mxu0 %vm82_vm1, %v486_v24 }
  0x6f   :  { %1994 = vmatmul.msk.bf16.vlgmr.msra.gmra.mxu1 %vm82_vm1, %v486_v24  ;;  %v1028_v24 = vunpack.c.l.b16 %v2157_v20 }
  0x71   :  { %v1036_v29 = vpack.c.b16 %v1028_v24, %v1028_v24  ;;  %v3117_v24 = vld [vmem:[%s3450_s3] ss:$0 sm:$0xff] }
  0x7c   :  { %1980 = vmatmul.msk.bf16.gmra.mxu0 %vm82_vm1, %v487_v27 }
  0x7f   :  { %1995 = vmatmul.msk.bf16.gmra.mxu1 %vm82_vm1, %v487_v27 }
  0x89   :  { %v105_v31 = vpop.f32.mrf.mxu0 }
  0x8c   :  { %v152_v32 = vpop.f32.mrf.mxu1  ;;  %1981 = vmatmul.msk.bf16.gmra.mxu0 %vm82_vm1, %v488_v30 }
  0x8d   :  { %v2961_v33 = vadd.f32 %v152_v32, %v105_v31  ;;  %v2555_v31 = vld [vmem:[%s3451_s4 + $0x8] sm:$0xff]  ;;  %v1048_v32 = vsel %vm751_vm2, %v1036_v29, 0  ;;  %v2585_v29 = vld [vmem:[%s3451_s4 + $0x90] sm:$0xff] }
  0x8e   :  { %826 = vmatpush.bf16.msra.mxu3 %v2555_v31  ;;  %1050 = vmatpush.bf16.msrb.mxu0 %v1048_v32  ;;  %v2565_v32 = vld [vmem:[%s3452_s5 + $0x20] sm:$0xff] }
  0x8f   :  { %1996 = vmatmul.msk.bf16.gmra.mxu1 %vm82_vm1, %v488_v30  ;;  %v1119_v30 = vpack.c.b16 %v1111_v25, %v1111_v25  ;;  %v2568_v25 = vld [vmem:[%s3451_s4 + $0x3c] sm:$0xff] }
  0x91   :  { %v107_v34 = vpop.f32.mrf.mxu0 }
  0x93   :  { %v2969_v40 = vpop.f32.mrf.mxu2  ;;  %v2971_v41 = vpop.f32.mrf.mxu3 }
  0x94   :  { %v154_v35 = vpop.f32.mrf.mxu1  ;;  %v234_v59 = vadd.f32 %v2971_v41, %v2969_v40  ;;  %v2594_v40 = vld [vmem:[%s3452_s5 + $0xa0] sm:$0xff]  ;;  %v2567_v41 = vld [vmem:[%s3452_s5 + $0x30] sm:$0xff] }
  0x95   :  { %v2965_v36 = vadd.f32 %v154_v35, %v107_v34  ;;  %v1128_v34 = vsel %vm751_vm2, %v1119_v30, 0  ;;  %v672_v35 = vld [vmem:[%s3452_s5 + $0x38] sm:$0xf]  ;;  %v2592_v30 = vld [vmem:[%s3452_s5 + $0x90] sm:$0xff] }
  0x96   :  { %1130 = vmatpush.bf16.msrb.mxu1 %v1128_v34 }
  0x99   :  { %v110_v37 = vpop.f32.mrf.mxu0 }
  0x9b   :  { %v2975_v45 = vpop.f32.mrf.mxu2  ;;  %v2977_v46 = vpop.f32.mrf.mxu3 }
  0x9c   :  { %v157_v38 = vpop.f32.mrf.mxu1 }
  0x9d   :  { %v2967_v39 = vadd.f32 %v157_v38, %v110_v37  ;;  %v941_v37 = vunpack.c.l.b16 %v672_v35  ;;  %v2571_v38 = vld [vmem:[%s3451_s4 + $0x54] sm:$0xff] }
  0x9e   :  { %759 = vmatpush.bf16.msra.mxu2 %v2571_v38 }
  0xa1   :  { %v112_v42 = vpop.f32.mrf.mxu0 }
  0xa2   :  { %760 = vmatpush.bf16.msra.mxu2 %v2570_v63 }
  0xa3   :  { %v2981_v52 = vpop.f32.mrf.mxu2  ;;  %v2983_v53 = vpop.f32.mrf.mxu3 }
  0xa4   :  { %v159_v43 = vpop.f32.mrf.mxu1 }
  0xa5   :  { %v2973_v44 = vadd.f32 %v159_v43, %v112_v42  ;;  %v2554_v42 = vld [vmem:[%s3451_s4] sm:$0xff]  ;;  %v2588_v43 = vld [vmem:[%s3451_s4 + $0xa8] sm:$0xff] }
  0xa6   :  { %827 = vmatpush.bf16.msra.mxu3 %v2554_v42  ;;  %1051 = vmatpush.bf16.msrb.mxu0 %v2588_v43  ;;  %v2581_v43 = vld [vmem:[%s3452_s5 + $0x6c] sm:$0xff] }
  0xa7   :  { %761 = vmatpush.bf16.msra.mxu2 %v2569_v9 }
  0xa9   :  { %v115_v47 = vpop.f32.mrf.mxu0 }
  0xaa   :  { %1052 = vmatpush.bf16.msrb.mxu0 %v2587_v6  ;;  %v2583_v6 = vld [vmem:[%s3451_s4 + $0x80] sm:$0xff] }
  0xab   :  { %v2991_v57 = vpop.f32.mrf.mxu2  ;;  %v2993_v58 = vpop.f32.mrf.mxu3  ;;  %762 = vmatpush.bf16.msra.mxu2 %v2568_v25 }
  0xac   :  { %v162_v48 = vpop.f32.mrf.mxu1 }
  0xad   :  { %v2979_v49 = vadd.f32 %v162_v48, %v115_v47  ;;  %v2595_v47 = vld [vmem:[%s3452_s5 + $0xa8] sm:$0xff]  ;;  %v949_v48 = vpack.c.b16 %v941_v37, %v941_v37 }
  0xae   :  { %1131 = vmatpush.bf16.msrb.mxu1 %v2595_v47  ;;  %1053 = vmatpush.bf16.msrb.mxu0 %v2586_v16 }
  0xaf   :  { %v958_v62 = vsel %vm751_vm2, %v949_v48, 0  ;;  %v2564_v48 = vld [vmem:[%s3452_s5 + $0x18] sm:$0xff] }
  0xb0   :  { %960 = vmatpush.bf16.msrb.mxu3 %v958_v62 }
  0xb1   :  { %v117_v50 = vpop.f32.mrf.mxu0 }
  0xb2   :  { %1132 = vmatpush.bf16.msrb.mxu1 %v2594_v40  ;;  %1054 = vmatpush.bf16.msrb.mxu0 %v2585_v29  ;;  %v2590_v40 = vld [vmem:[%s3452_s5 + $0x80] sm:$0xff]  ;;  %v2578_v29 = vld [vmem:[%s3452_s5 + $0x54] sm:$0xff] }
  0xb3   :  { %v3003_v1 = vpop.f32.mrf.mxu2  ;;  %v3005_v2 = vpop.f32.mrf.mxu3 }
  0xb4   :  { %v164_v51 = vpop.f32.mrf.mxu1  ;;  %961 = vmatpush.bf16.msrb.mxu3 %v2567_v41  ;;  %v2333_v41 = vld [vmem:[%s3451_s4 + $0x128] sm:$0xf] }
  0xb5   :  { %v2985_v54 = vadd.f32 %v164_v51, %v117_v50 }
  0xb6   :  { %1133 = vmatpush.bf16.msrb.mxu1 %v2593_v17 }
  0xb8   :  { %962 = vmatpush.bf16.msrb.mxu3 %v2566_v18 }
  0xb9   :  { %v2987_v55 = vpop.f32.mrf.mxu0 }
  0xba   :  { %v309_v7 = vadd.f32 %v2987_v55, %v2961_v33  ;;  %v2084_v33 = vld [vmem:[%s3452_s5 + $0x74] sm:$0xf]  ;;  %1134 = vmatpush.bf16.msrb.mxu1 %v2592_v30  ;;  %v241_v30 = vadd.f32 %v2993_v58, %v2991_v57 }
  0xbb   :  { %v3020_v10 = vpop.f32.mrf.mxu2  ;;  %v3022_v11 = vpop.f32.mrf.mxu3  ;;  %v879_v19 = vunpack.c.l.b16 %v2084_v33  ;;  %v2579_v33 = vld [vmem:[%s3452_s5 + $0x5c] sm:$0xff] }
  0xbc   :  { %v2989_v56 = vpop.f32.mrf.mxu1  ;;  %963 = vmatpush.bf16.msrb.mxu3 %v2565_v32  ;;  %v2561_v32 = vld [vmem:[%s3452_s5] sm:$0xff] }
  0xbd   :  { %v358_v8 = vadd.f32 %v2989_v56, %v234_v59  ;;  %v239_v59 = vadd.f32 %v2983_v53, %v2981_v52  ;;  %v2563_v53 = vld [vmem:[%s3452_s5 + $0x10] sm:$0xff] }
  0xc0   :  { %964 = vmatpush.bf16.msrb.mxu3 %v2564_v48  ;;  %v2576_v48 = vld [vmem:[%s3452_s5 + $0x44] sm:$0xff] }
  0xc1   :  { %v2998_v60 = vpop.f32.mrf.mxu0 }
  0xc3   :  { %v410_v26 = vpop.f32.mrf.mxu2  ;;  %v459_v27 = vpop.f32.mrf.mxu3 }
  0xc4   :  { %v3000_v61 = vpop.f32.mrf.mxu1  ;;  %v425_v12 = vadd.f32 %v410_v26, %v309_v7  ;;  %v474_v13 = vadd.f32 %v459_v27, %v358_v8  ;;  %v887_v26 = vpack.c.b16 %v879_v19, %v879_v19  ;;  %v236_v27 = vadd.f32 %v2977_v46, %v2975_v45  ;;  %v2377_v7 = vld [vmem:[%s3452_s5 + $0x128] sm:$0xf]  ;;  %965 = vmatpush.bf16.msrb.mxu3 %v2563_v53 }
  0xc5   :  { %v310_v45 = vadd.f32 %v2998_v60, %v2965_v36  ;;  %v2584_v36 = vld [vmem:[%s3451_s4 + $0x88] sm:$0xff] }
  0xc6   :  { %v896_v31 = vsel %vm751_vm2, %v887_v26, 0  ;;  %v359_v46 = vadd.f32 %v3000_v61, %v236_v27  ;;  %v2591_v60 = vld [vmem:[%s3452_s5 + $0x88] sm:$0xff]  ;;  %1055 = vmatpush.bf16.msrb.mxu0 %v2584_v36 }
  0xc7   :  { %898 = vmatpush.bf16.msrb.mxu2 %v896_v31  ;;  %1135 = vmatpush.bf16.msrb.mxu1 %v2591_v60 }
  0xc9   :  { %v3010_v4 = vpop.f32.mrf.mxu0 }
  0xca   :  { %v311_v52 = vadd.f32 %v3010_v4, %v2967_v39  ;;  %1056 = vmatpush.bf16.msrb.mxu0 %v2583_v6  ;;  %v1456_v39 = vunpack.c.l.b16 %v2377_v7  ;;  %v246_v7 = vadd.f32 %v3022_v11, %v3020_v10 }
  0xcb   :  { %v412_v0 = vpop.f32.mrf.mxu2  ;;  %v461_v3 = vpop.f32.mrf.mxu3  ;;  %899 = vmatpush.bf16.msrb.mxu2 %v2581_v43  ;;  %1136 = vmatpush.bf16.msrb.mxu1 %v2590_v40  ;;  %v244_v43 = vadd.f32 %v3005_v2, %v3003_v1  ;;  %v2621_v1 = vld [vmem:[%s3452_s5 + $0x110] sm:$0xff]  ;;  %v2575_v40 = vld [vmem:[%s3452_s5 + $0x3c] sm:$0xff] }
  0xcc   :  { %v3012_v5 = vpop.f32.mrf.mxu1  ;;  %v426_v38 = vadd.f32 %v412_v0, %v310_v45  ;;  %v475_v42 = vadd.f32 %v461_v3, %v359_v46  ;;  %v2580_v3 = vld [vmem:[%s3452_s5 + $0x64] sm:$0xff]  ;;  %v1464_v18 = vpack.c.b16 %v1456_v39, %v1456_v39 }
  0xcd   :  { %v360_v8 = vadd.f32 %v3012_v5, %v239_v59  ;;  %v2582_v5 = vld [vmem:[%s3451_s4 + $0x78] sm:$0xff]  ;;  %v2616_v45 = vld [vmem:[%s3451_s4 + $0x120] sm:$0xff] }
  0xce   :  { %1057 = vmatpush.bf16.msrb.mxu0 %v2582_v5  ;;  %v2623_v46 = vld [vmem:[%s3452_s5 + $0x120] sm:$0xff] }
  0xcf   :  { %900 = vmatpush.bf16.msrb.mxu2 %v2580_v3  ;;  %v2612_v39 = vld [vmem:[%s3451_s4 + $0x100] sm:$0xff] }
  0xd1   :  { %v3028_v14 = vpop.f32.mrf.mxu0 }
  0xd3   :  { %v415_v34 = vpop.f32.mrf.mxu2  ;;  %v464_v35 = vpop.f32.mrf.mxu3  ;;  %901 = vmatpush.bf16.msrb.mxu2 %v2579_v33 }
  0xd4   :  { %v3030_v15 = vpop.f32.mrf.mxu1  ;;  %v427_v4 = vadd.f32 %v415_v34, %v311_v52  ;;  %v312_v34 = vadd.f32 %v3028_v14, %v2973_v44  ;;  %v2615_v44 = vld [vmem:[%s3451_s4 + $0x118] sm:$0xff] }
  0xd5   :  { %v361_v57 = vadd.f32 %v3030_v15, %v241_v30  ;;  %v2622_v14 = vld [vmem:[%s3452_s5 + $0x118] sm:$0xff] }
  0xd7   :  { %902 = vmatpush.bf16.msrb.mxu2 %v2578_v29 }
  0xd9   :  { %v3050_v22 = vpop.f32.mrf.mxu0 }
  0xda   :  { %v313_v2 = vadd.f32 %v3050_v22, %v2979_v49  ;;  %v2613_v49 = vld [vmem:[%s3451_s4 + $0x108] sm:$0xff] }
  0xdb   :  { %v417_v16 = vpop.f32.mrf.mxu2  ;;  %v466_v17 = vpop.f32.mrf.mxu3  ;;  %v2620_v22 = vld [vmem:[%s3452_s5 + $0x108] sm:$0xff] }
  0xdc   :  { %v3052_v23 = vpop.f32.mrf.mxu1 }
  0xe1   :  { %v3077_v50 = vpop.f32.mrf.mxu0 }
  0xe4   :  { %v3079_v51 = vpop.f32.mrf.mxu1 }
  0xe9   :  { %v526_v55 = vpop.f32.mrf.mxu0 }
  0xea   :  { %v541_v20 = vadd.f32 %v526_v55, %v425_v12  ;;  %v1373_v12 = vunpack.c.l.b16 %v2333_v41  ;;  %v2589_v55 = vld [vmem:[%s3452_s5 + $0x78] sm:$0xff] }
  0xeb   :  { %1137 = vmatpush.bf16.msrb.mxu1 %v2589_v55  ;;  %v2289_v55 = vld [vmem:[%s3452_s5 + $0xec] sm:$0xf] }
  0xec   :  { %v575_v56 = vpop.f32.mrf.mxu1 }
  0xed   :  { %v590_v21 = vadd.f32 %v575_v56, %v474_v13  ;;  %v476_v13 = vadd.f32 %v464_v35, %v360_v8  ;;  %v1381_v56 = vpack.c.b16 %v1373_v12, %v1373_v12  ;;  %v2577_v35 = vld [vmem:[%s3452_s5 + $0x4c] sm:$0xff] }
  0xee   :  { %903 = vmatpush.bf16.msrb.mxu2 %v2577_v35 }
  0xef   :  { %v596_v28 = vmax.f32 %v541_v20, %v590_v21  ;;  %v2562_v21 = vld [vmem:[%s3452_s5 + $0x8] sm:$0xff]  ;;  %v1393_v27 = vsel %vm751_vm2, %v1381_v56, 0 }
  0xf0   :  { %966 = vmatpush.bf16.msrb.mxu3 %v2562_v21  ;;  %1395 = vmatpush.bf16.msra.mxu0 %v1393_v27  ;;  %v1284_v21 = vunpack.c.l.b16 %v2289_v55 }
  0xf1   :  { %v606_v37 = vadd.f32 %v3117_v24, %v596_v28  ;;  %v528_v61 = vpop.f32.mrf.mxu0  ;;  %v1473_v28 = vsel %vm751_vm2, %v1464_v18, 0 }
  0xf2   :  { %v542_v62 = vadd.f32 %v528_v61, %v426_v38  ;;  %1475 = vmatpush.bf16.msra.mxu1 %v1473_v28  ;;  %v477_v38 = vadd.f32 %v466_v17, %v361_v57  ;;  %v420_v61 = vpop.f32.mrf.mxu2  ;;  %904 = vmatpush.bf16.msrb.mxu2 %v2576_v48 }
  0xf3   :  { %613 = vst.msk [vmem:[#allocation2] sm:$0xff] %vm612_vm3, %v606_v37  ;;  %v428_v37 = vadd.f32 %v417_v16, %v312_v34  ;;  %v429_v3 = vadd.f32 %v420_v61, %v313_v2  ;;  %v363_v16 = vadd.f32 %v3079_v51, %v246_v7  ;;  %v2606_v7 = vld [vmem:[%s3452_s5 + $0xcc] sm:$0xff] }
  0xf4   :  { %v577_v47 = vpop.f32.mrf.mxu1  ;;  %967 = vmatpush.bf16.msrb.mxu3 %v2561_v32  ;;  %1396 = vmatpush.bf16.msra.mxu0 %v2616_v45 }
  0xf5   :  { %v591_v63 = vadd.f32 %v577_v47, %v475_v42  ;;  %v469_v47 = vpop.f32.mrf.mxu3 }
  0xf6   :  { %1476 = vmatpush.bf16.msra.mxu1 %v2623_v46  ;;  %905 = vmatpush.bf16.msrb.mxu2 %v2575_v40  ;;  %v1292_v46 = vpack.c.b16 %v1284_v21, %v1284_v21 }
  0xf7   :  { %v597_v0 = vmax.f32 %v542_v62, %v591_v63  ;;  %v2614_v62 = vld [vmem:[%s3451_s4 + $0x110] sm:$0xff]  ;;  %v362_v63 = vadd.f32 %v3052_v23, %v244_v43 }
  0xf8   :  { %1397 = vmatpush.bf16.msra.mxu0 %v2615_v44 }
  0xf9   :  { %v607_v9 = vadd.f32 %v3117_v24, %v597_v0  ;;  %v531_v19 = vpop.f32.mrf.mxu0  ;;  %v478_v6 = vadd.f32 %v469_v47, %v362_v63  ;;  %v2608_v47 = vld [vmem:[%s3452_s5 + $0xdc] sm:$0xff] }
  0xfa   :  { %v543_v25 = vadd.f32 %v531_v19, %v427_v4  ;;  %1477 = vmatpush.bf16.msra.mxu1 %v2622_v14  ;;  %v2619_v4 = vld [vmem:[%s3452_s5 + $0x100] sm:$0xff] }
  0xfb   :  { %614 = vst.msk [vmem:[#allocation2 + $0x8] sm:$0xff] %vm612_vm3, %v607_v9  ;;  %v422_v9 = vpop.f32.mrf.mxu2 }
  0xfc   :  { %v580_v20 = vpop.f32.mrf.mxu1  ;;  %1398 = vmatpush.bf16.msra.mxu0 %v2614_v62 }
  0xfd   :  { %v592_v26 = vadd.f32 %v580_v20, %v476_v13  ;;  %v471_v12 = vpop.f32.mrf.mxu3  ;;  %v314_v13 = vadd.f32 %v3077_v50, %v2985_v54  ;;  %v2611_v54 = vld [vmem:[%s3451_s4 + $0xf8] sm:$0xff] }
  0xfe   :  { %1478 = vmatpush.bf16.msra.mxu1 %v2621_v1  ;;  %v479_v17 = vadd.f32 %v471_v12, %v363_v16  ;;  %v2618_v50 = vld [vmem:[%s3452_s5 + $0xf8] sm:$0xff] }
  0xff   :  { %v598_v31 = vmax.f32 %v543_v25, %v592_v26  ;;  %v430_v11 = vadd.f32 %v422_v9, %v314_v13  ;;  %v2610_v25 = vld [vmem:[%s3451_s4 + $0xf0] sm:$0xff]  ;;  %v2605_v9 = vld [vmem:[%s3452_s5 + $0xc4] sm:$0xff]  ;;  %v2604_v16 = vld [vmem:[%s3452_s5 + $0xbc] sm:$0xff] }
 0x100   :  { %1399 = vmatpush.bf16.msra.mxu0 %v2613_v49  ;;  %v2617_v26 = vld [vmem:[%s3452_s5 + $0xf0] sm:$0xff] }
 0x101   :  { %v608_v58 = vadd.f32 %v3117_v24, %v598_v31  ;;  %v533_v15 = vpop.f32.mrf.mxu0 }
 0x102   :  { %v544_v36 = vadd.f32 %v533_v15, %v428_v37  ;;  %1479 = vmatpush.bf16.msra.mxu1 %v2620_v22  ;;  %v619_v18 = vld [vmem:[#allocation2] ss:$2 sm:$0xff]  ;;  %v627_v19 = vld [vmem:[#allocation2 + $0x1] ss:$2 sm:$0xff] }
 0x103   :  { %615 = vst.msk [vmem:[#allocation2 + $0x10] sm:$0xff] %vm612_vm3, %v608_v58  ;;  %v634_v28 = vmax.f32 %v619_v18, %v627_v19  ;;  %v2245_v37 = vld [vmem:[%s3451_s4 + $0xec] sm:$0xf]  ;;  %v2598_v19 = vld [vmem:[%s3451_s4 + $0xc4] sm:$0xff] }
 0x104   :  { %v582_v42 = vpop.f32.mrf.mxu1  ;;  %1400 = vmatpush.bf16.msra.mxu0 %v2612_v39  ;;  %v2600_v39 = vld [vmem:[%s3451_s4 + $0xd4] sm:$0xff] }
 0x105   :  { %v593_v60 = vadd.f32 %v582_v42, %v477_v38  ;;  %v3273_v34 = vmax.f32 %v634_v28, 0.0  ;;  %v2609_v38 = vld [vmem:[%s3452_s5 + $0xe4] sm:$0xff]  ;;  %v1201_v42 = vunpack.c.l.b16 %v2245_v37 }
 0x106   :  { %1480 = vmatpush.bf16.msra.mxu1 %v2619_v4  ;;  %v2632_v37 = vld [vmem:[%s3454_s7 + $0x40] sm:$0xff] }
 0x107   :  { %v599_v59 = vmax.f32 %v544_v36, %v593_v60  ;;  %v678_v48 = vrot.slane %v3273_v34, 1  ;;  %v1209_v62 = vpack.c.b16 %v1201_v42, %v1201_v42 }
 0x108   :  { %1401 = vmatpush.bf16.msra.mxu0 %v2611_v54  ;;  %v2603_v54 = vld [vmem:[%s3452_s5 + $0xb4] sm:$0xff] }
 0x109   :  { %v609_v0 = vadd.f32 %v3117_v24, %v599_v59  ;;  %v536_v52 = vpop.f32.mrf.mxu0  ;;  %v974_v59 = vrot.slane %v3273_v34, 2  ;;  %v1221_v22 = vsel %vm751_vm2, %v1209_v62, 0  ;;  %v2630_v62 = vld [vmem:[%s3454_s7 + $0x30] sm:$0xff] }
 0x10a   :  { %v545_v23 = vadd.f32 %v536_v52, %v429_v3  ;;  %1481 = vmatpush.bf16.msra.mxu1 %v2618_v50  ;;  %v621_v29 = vld [vmem:[#allocation2 + $0x10] ss:$2 sm:$0xf]  ;;  %v629_v30 = vld [vmem:[#allocation2 + $0x11] ss:$2 sm:$0xf] }
 0x10b   :  { %616 = vst.msk [vmem:[#allocation2 + $0x18] sm:$0xff] %vm612_vm3, %v609_v0  ;;  %v635_v58 = vmax.f32 %v621_v29, %v629_v30 }
 0x10c   :  { %v585_v53 = vpop.f32.mrf.mxu1  ;;  %1402 = vmatpush.bf16.msra.mxu0 %v2610_v25  ;;  %v2597_v25 = vld [vmem:[%s3451_s4 + $0xbc] sm:$0xff] }
 0x10d   :  { %v594_v41 = vadd.f32 %v585_v53, %v478_v6  ;;  %v3287_v44 = vmax.f32 %v635_v58, 0.0  ;;  %v2628_v58 = vld [vmem:[%s3454_s7 + $0x20] sm:$0xff] }
 0x10e   :  { %1482 = vmatpush.bf16.msra.mxu1 %v2617_v26  ;;  %v2596_v26 = vld [vmem:[%s3451_s4 + $0xb4] sm:$0xff] }
 0x10f   :  { %v600_v8 = vmax.f32 %v545_v23, %v594_v41  ;;  %v679_v60 = vrot.slane %v3287_v44, 1  ;;  %v975_v61 = vrot.slane %v3287_v44, 2  ;;  %v2607_v23 = vld [vmem:[%s3452_s5 + $0xd4] sm:$0xff]  ;;  %v2602_v41 = vld [vmem:[%s3451_s4 + $0xe4] sm:$0xff]  ;;  %v1320_v4 = vrot.slane %v3287_v44, 4 }
 0x110   :  { %v1148_v50 = vrot.slane %v3287_v44, 3  ;;  %v2637_v44 = vld [vmem:[%s3454_s7 + $0x68] sm:$0xff] }
 0x111   :  { %v610_v10 = vadd.f32 %v3117_v24, %v600_v8  ;;  %v538_v33 = vpop.f32.mrf.mxu0  ;;  %v680_v3 = vsel %vm677_vm4, %v678_v48, %v679_v60  ;;  %v976_v40 = vsel %vm92_vm0, %v974_v59, %v975_v61  ;;  %v2601_v8 = vld [vmem:[%s3451_s4 + $0xdc] sm:$0xff]  ;;  %v2626_v60 = vld [vmem:[%s3454_s7 + $0x10] sm:$0xff]  ;;  %v2641_v48 = vld [vmem:[%s3454_s7 + $0x88] sm:$0xff] }
 0x112   :  { %v546_v51 = vadd.f32 %v538_v33, %v430_v11  ;;  %v2636_v61 = vld [vmem:[%s3454_s7 + $0x60] sm:$0xff] }
 0x113   :  { %617 = vst.msk [vmem:[#allocation2 + $0x20] sm:$0xff] %vm612_vm3, %v610_v10  ;;  %v1319_v10 = vrot.slane %v3273_v34, 4 }
 0x114   :  { %v587_v5 = vpop.f32.mrf.mxu1 }
 0x115   :  { %v595_v56 = vadd.f32 %v587_v5, %v479_v17  ;;  %v1321_v33 = vsel %vm751_vm2, %v1319_v10, %v1320_v4  ;;  %v2599_v5 = vld [vmem:[%s3451_s4 + $0xcc] sm:$0xff] }
 0x117   :  { %v601_v20 = vmax.f32 %v546_v51, %v595_v56  ;;  %v1147_v56 = vrot.slane %v3273_v34, 3 }
 0x119   :  { %v611_v27 = vadd.f32 %v3117_v24, %v601_v20  ;;  %v1301_v24 = vsel %vm751_vm2, %v1292_v46, 0  ;;  %v1149_v20 = vsel %vm1146_vm5, %v1147_v56, %v1148_v50 }
 0x11a   :  { %v623_v31 = vld [vmem:[#allocation2 + $0x18] ss:$2 sm:$0xff]  ;;  %v631_v32 = vld [vmem:[#allocation2 + $0x19] ss:$2 sm:$0xff] }
 0x11b   :  { %618 = vst.msk [vmem:[#allocation2 + $0x28] sm:$0xff] %vm612_vm3, %v611_v27  ;;  %v636_v45 = vmax.f32 %v623_v31, %v631_v32 }
 0x11d   :  { %v3275_v57 = vmax.f32 %v636_v45, 0.0 }
 0x11f   :  { %v642_v35 = vpack.c.bf16 %v3275_v57, %v3273_v34  ;;  %v681_v1 = vrot.slane %v3275_v57, 1  ;;  %v977_v63 = vrot.slane %v3275_v57, 2  ;;  %v1322_v13 = vrot.slane %v3275_v57, 4 }
 0x120   :  { %v1150_v51 = vrot.slane %v3275_v57, 3  ;;  %v2633_v57 = vld [vmem:[%s3454_s7 + $0x48] sm:$0xff] }
 0x121   :  { %2069 = vmatmul.msk.bf16.vlgmr.msra.gmra.mxu3 %vm612_vm3, %v642_v35 }
 0x122   :  { %1303 = vmatpush.bf16.msra.mxu3 %v1301_v24  ;;  %v625_v14 = vld [vmem:[#allocation2 + $0x28] ss:$2 sm:$0xf]  ;;  %v633_v15 = vld [vmem:[#allocation2 + $0x29] ss:$2 sm:$0xf] }
 0x123   :  { %v637_v43 = vmax.f32 %v625_v14, %v633_v15  ;;  %v2643_v24 = vld [vmem:[%s3454_s7 + $0x98] sm:$0xff]  ;;  %v2642_v14 = vld [vmem:[%s3454_s7 + $0x90] sm:$0xff] }
 0x125   :  { %v641_v36 = vmax.f32 %v637_v43, 0.0  ;;  %v2631_v43 = vld [vmem:[%s3454_s7 + $0x38] sm:$0xff] }
 0x126   :  { %1304 = vmatpush.bf16.msra.mxu3 %v2609_v38  ;;  %v2627_v38 = vld [vmem:[%s3454_s7 + $0x18] sm:$0xff] }
 0x127   :  { %v682_v2 = vrot.slane %v641_v36, 1  ;;  %v978_v0 = vrot.slane %v641_v36, 2  ;;  %v1323_v12 = vrot.slane %v641_v36, 4  ;;  %v1151_v17 = vrot.slane %v641_v36, 3 }
 0x129   :  { %v683_v6 = vsel %vm677_vm4, %v681_v1, %v682_v2  ;;  %v979_v52 = vsel %vm92_vm0, %v977_v63, %v978_v0  ;;  %v1324_v11 = vsel %vm751_vm2, %v1322_v13, %v1323_v12  ;;  %v1152_v18 = vsel %vm1146_vm5, %v1150_v51, %v1151_v17  ;;  %v2625_v63 = vld [vmem:[%s3454_s7 + $0x8] sm:$0xff]  ;;  %v2635_v0 = vld [vmem:[%s3454_s7 + $0x58] sm:$0xff] }
 0x12a   :  { %1305 = vmatpush.bf16.msra.mxu3 %v2608_v47  ;;  %v686_v53 = vpack.c.bf16 %v683_v6, %v680_v3  ;;  %v982_v49 = vpack.c.bf16 %v979_v52, %v976_v40  ;;  %v1327_v55 = vpack.c.bf16 %v1324_v11, %v1321_v33  ;;  %v1155_v21 = vpack.c.bf16 %v1152_v18, %v1149_v20  ;;  %v2640_v3 = vld [vmem:[%s3454_s7 + $0x80] sm:$0xff]  ;;  %v2629_v6 = vld [vmem:[%s3454_s7 + $0x28] sm:$0xff] }
 0x12c   :  { %2040 = vmatmul.msk.bf16.vlgmr.msra.gmra.mxu2 %vm612_vm3, %v686_v53  ;;  %2186 = vmatmul.msk.bf16.vlgmr.msrb.gmra.mxu0 %vm612_vm3, %v982_v49 }
 0x12d   :  { %2230 = vmatmul.msk.bf16.vlgmr.msrb.gmra.mxu1 %vm612_vm3, %v982_v49  ;;  %1223 = vmatpush.bf16.msra.mxu2 %v1221_v22  ;;  %v2624_v22 = vld [vmem:[%s3454_s7] sm:$0xff] }
 0x12e   :  { %1306 = vmatpush.bf16.msra.mxu3 %v2607_v23  ;;  %1752 = vmatpush.bf16.msrb.mxu1 %v2643_v24  ;;  %v2634_v23 = vld [vmem:[%s3454_s7 + $0x50] sm:$0xff] }
 0x131   :  { %2142 = vmatmul.msk.bf16.vlgmr.msrb.gmra.mxu3 %vm612_vm3, %v642_v35  ;;  %1224 = vmatpush.bf16.msra.mxu2 %v2602_v41  ;;  %v2638_v35 = vld [vmem:[%s3454_s7 + $0x70] sm:$0xff] }
 0x132   :  { %1307 = vmatpush.bf16.msra.mxu3 %v2606_v7  ;;  %1690 = vmatpush.bf16.msrb.mxu0 %v2638_v35 }
 0x133   :  { %1753 = vmatpush.bf16.msrb.mxu1 %v2642_v14 }
 0x135   :  { %1225 = vmatpush.bf16.msra.mxu2 %v2601_v8  ;;  %v2639_v8 = vld [vmem:[%s3454_s7 + $0x78] sm:$0xff] }
 0x136   :  { %1308 = vmatpush.bf16.msra.mxu3 %v2605_v9  ;;  %1691 = vmatpush.bf16.msrb.mxu0 %v2637_v44 }
 0x137   :  { %1754 = vmatpush.bf16.msrb.mxu1 %v2641_v48 }
 0x139   :  { %1226 = vmatpush.bf16.msra.mxu2 %v2600_v39 }
 0x13a   :  { %1309 = vmatpush.bf16.msra.mxu3 %v2604_v16  ;;  %1692 = vmatpush.bf16.msrb.mxu0 %v2636_v61  ;;  %v2649_v16 = vld [vmem:[%s3453_s6] ss:$0 sm:$0xff] }
 0x13b   :  { %1755 = vmatpush.bf16.msrb.mxu1 %v2640_v3 }
 0x13c   :  { %2113 = vmatmul.msk.bf16.vlgmr.msrb.gmra.mxu2 %vm612_vm3, %v686_v53  ;;  %2362 = vmatmul.msk.bf16.vlgmr.msra.gmra.mxu0 %vm612_vm3, %v1327_v55 }
 0x13d   :  { %2406 = vmatmul.msk.bf16.vlgmr.msra.gmra.mxu1 %vm612_vm3, %v1327_v55  ;;  %1227 = vmatpush.bf16.msra.mxu2 %v2599_v5 }
 0x13e   :  { %1310 = vmatpush.bf16.msra.mxu3 %v2603_v54  ;;  %1693 = vmatpush.bf16.msrb.mxu0 %v2635_v0 }
 0x13f   :  { %1756 = vmatpush.bf16.msrb.mxu1 %v2639_v8 }
 0x141   :  { %1228 = vmatpush.bf16.msra.mxu2 %v2598_v19  ;;  %2318 = vmatmul.msk.bf16.vlgmr.msra.gmra.mxu3 %vm612_vm3, %v1155_v21 }
 0x142   :  { %1629 = vmatpush.bf16.msrb.mxu3 %v2628_v58  ;;  %1694 = vmatpush.bf16.msrb.mxu0 %v2634_v23 }
 0x145   :  { %1229 = vmatpush.bf16.msra.mxu2 %v2597_v25 }
 0x146   :  { %1630 = vmatpush.bf16.msrb.mxu3 %v2627_v38 }
 0x149   :  { %1230 = vmatpush.bf16.msra.mxu2 %v2596_v26 }
 0x14a   :  { %1631 = vmatpush.bf16.msrb.mxu3 %v2626_v60 }
 0x14c   :  { %2274 = vmatmul.msk.bf16.vlgmr.msra.gmra.mxu2 %vm612_vm3, %v1155_v21 }
 0x14d   :  { %1580 = vmatpush.bf16.msrb.mxu2 %v2633_v57 }
 0x14e   :  { %1632 = vmatpush.bf16.msrb.mxu3 %v2625_v63  ;;  %v2644_v63 = vld [vmem:[%s3456_s9] sm:$0xff] }
 0x151   :  { %1581 = vmatpush.bf16.msrb.mxu2 %v2632_v37 }
 0x152   :  { %1633 = vmatpush.bf16.msrb.mxu3 %v2624_v22  ;;  %v2650_v22 = vld [vmem:[%s3455_s8] ss:$0 sm:$0xff]  ;;  %s2682_s8 = smov [#allocation4]  }
 0x155   :  { %1582 = vmatpush.bf16.msrb.mxu2 %v2631_v43 }
 0x159   :  { %1583 = vmatpush.bf16.msrb.mxu2 %v2630_v62 }
 0x15d   :  { %1584 = vmatpush.bf16.msrb.mxu2 %v2629_v6 }
 0x1a4   :  { %v829_v27 = vpop.f32.mrf.mxu3 }
 0x1a9   :  { %v1059_v32 = vpop.f32.mrf.mxu0 }
 0x1aa   :  { %v1139_v45 = vpop.f32.mrf.mxu1 }
 0x1ac   :  { %v831_v28 = vpop.f32.mrf.mxu3 }
 0x1af   :  { %v764_v29 = vpop.f32.mrf.mxu2 }
 0x1b0   :  { %v830_v1 = vadd.f32 %v829_v27, %v764_v29 }
 0x1b1   :  { %v1061_v15 = vpop.f32.mrf.mxu0 }
 0x1b2   :  { %v1141_v42 = vpop.f32.mrf.mxu1  ;;  %v1064_v49 = vadd.f32 %v1059_v32, %v830_v1  ;;  %v2646_v1 = vld [vmem:[%s3456_s9 + $0x10] sm:$0xff] }
 0x1b4   :  { %v969_v30 = vpop.f32.mrf.mxu3 }
 0x1b7   :  { %v766_v31 = vpop.f32.mrf.mxu2 }
 0x1b8   :  { %v832_v12 = vadd.f32 %v831_v28, %v766_v31 }
 0x1b9   :  { %v1404_v40 = vpop.f32.mrf.mxu0 }
 0x1ba   :  { %v1484_v41 = vpop.f32.mrf.mxu1  ;;  %v1065_v5 = vadd.f32 %v1061_v15, %v832_v12 }
 0x1bc   :  { %v971_v46 = vpop.f32.mrf.mxu3 }
 0x1bf   :  { %v907_v34 = vpop.f32.mrf.mxu2 }
 0x1c0   :  { %v970_v36 = vadd.f32 %v969_v30, %v907_v34 }
 0x1c1   :  { %v1406_v50 = vpop.f32.mrf.mxu0 }
 0x1c2   :  { %v1144_v2 = vadd.f32 %v1139_v45, %v970_v36  ;;  %v1486_v51 = vpop.f32.mrf.mxu1 }
 0x1c4   :  { %v1312_v59 = vpop.f32.mrf.mxu3 }
 0x1c5   :  { %v1317_v52 = vadd.f32 %v1312_v59, %v1144_v2  ;;  %v2645_v2 = vld [vmem:[%s3456_s9 + $0x8] sm:$0xff] }
 0x1c7   :  { %v909_v47 = vpop.f32.mrf.mxu2  ;;  %v1489_v39 = vadd.f32 %v1484_v41, %v1317_v52 }
 0x1c8   :  { %v972_v53 = vadd.f32 %v971_v46, %v909_v47  ;;  %v1776_v47 = vld [vmem:[%s3456_s9 + $0x18] sm:$0x1] }
 0x1c9   :  { %v1794_v48 = vunpack.c.l.b16 %v1776_v47 }
 0x1ca   :  { %v1145_v4 = vadd.f32 %v1141_v42, %v972_v53 }
 0x1cb   :  { %v1798_v59 = vpack.c.b16 %v1794_v48, %v1794_v48 }
 0x1cc   :  { %v1314_v10 = vpop.f32.mrf.mxu3 }
 0x1cd   :  { %v1318_v17 = vadd.f32 %v1314_v10, %v1145_v4  ;;  %v1808_v62 = vsel %vm1806_vm8, %v1798_v59, 0  ;;  %v2651_v4 = vld [vmem:[%s3457_s10] ss:$0 sm:$0xff]  ;;  %s1844_s10 = sshll.u32 %s2682_s8, 4  ;;  %s1845_s10 = int_to_ptr.vmem [resolvable:$true] %s1844_s10 }
 0x1ce   :  { %1814 = vmatpush.bf16.msra.mxu2 %v1808_v62 }
 0x1cf   :  { %v1232_v7 = vpop.f32.mrf.mxu2  ;;  %v1490_v56 = vadd.f32 %v1486_v51, %v1318_v17 }
 0x1d0   :  { %v1237_v9 = vadd.f32 %v1232_v7, %v1064_v49 }
 0x1d2   :  { %v1409_v13 = vadd.f32 %v1404_v40, %v1237_v9  ;;  %1815 = vmatpush.bf16.msra.mxu2 %v2646_v1 }
 0x1d4   :  { %v1491_v11 = vmax.f32 %v1409_v13, %v1489_v39 }
 0x1d6   :  { %v1497_v33 = vadd.f32 %v2649_v16, %v1491_v11  ;;  %1816 = vmatpush.bf16.msra.mxu2 %v2645_v2 }
 0x1d7   :  { %v1234_v55 = vpop.f32.mrf.mxu2 }
 0x1d8   :  { %1500 = vst.msk [vmem:[#allocation3] sm:$0xff] %vm1499_vm6, %v1497_v33  ;;  %v1238_v54 = vadd.f32 %v1234_v55, %v1065_v5 }
 0x1da   :  { %v1410_v18 = vadd.f32 %v1406_v50, %v1238_v54  ;;  %1817 = vmatpush.bf16.msra.mxu2 %v2644_v63 }
 0x1dc   :  { %v1492_v19 = vmax.f32 %v1410_v18, %v1490_v56 }
 0x1de   :  { %v1498_v20 = vadd.f32 %v2649_v16, %v1492_v19 }
 0x1df   :  { %v1502_v21 = vld [vmem:[#allocation3] ss:$2 sm:$0xf]  ;;  %v1506_v25 = vld [vmem:[#allocation3 + $0x1] ss:$2 sm:$0xf] }
 0x1e0   :  { %1501 = vst.msk [vmem:[#allocation3 + $0x8] sm:$0xff] %vm1499_vm6, %v1498_v20  ;;  %v1509_v26 = vmax.f32 %v1502_v21, %v1506_v25 }
 0x1e2   :  { %v1511_v27 = vmax.f32 %v1509_v26, 0.0 }
 0x1e4   :  { %v1513_v28 = vpack.c.bf16 %v1511_v27, %v1511_v27 }
 0x1e6   :  { %v1538_v45 = vunpack.c.l.b16 %v1513_v28 }
 0x1e7   :  { %v1504_v29 = vld [vmem:[#allocation3 + $0x8] ss:$2 sm:$0xf]  ;;  %v1508_v30 = vld [vmem:[#allocation3 + $0x9] ss:$2 sm:$0xf] }
 0x1e8   :  { %v1510_v31 = vmax.f32 %v1504_v29, %v1508_v30  ;;  %v1540_v57 = vrot.slane %v1538_v45, 1  ;;  %v1650_v58 = vrot.slane %v1538_v45, 2  ;;  %v1712_v35 = vrot.slane %v1538_v45, 3 }
 0x1ea   :  { %v1512_v32 = vmax.f32 %v1510_v31, 0.0 }
 0x1ec   :  { %v1514_v46 = vpack.c.bf16 %v1512_v32, %v1512_v32 }
 0x1ee   :  { %v1539_v34 = vunpack.c.l.b16 %v1514_v46 }
 0x1f0   :  { %v1542_v24 = vsel %vm1541_vm7, %v1539_v34, %v1540_v57  ;;  %v1590_v37 = vrot.slane %v1539_v34, 7  ;;  %v1651_v38 = vrot.slane %v1539_v34, 1  ;;  %v1713_v44 = vrot.slane %v1539_v34, 2 }
 0x1f1   :  { %v1543_v14 = vpack.c.b16 %v1542_v24, %v1542_v24 }
 0x1f2   :  { %v1591_v15 = vsel %vm1541_vm7, %v1590_v37, %v1538_v45  ;;  %v1652_v42 = vsel %vm1541_vm7, %v1651_v38, %v1650_v58  ;;  %v1714_v43 = vsel %vm1541_vm7, %v1713_v44, %v1712_v35 }
 0x1f3   :  { %2437 = vmatmul.msk.bf16.vlgmr.msrb.gmra.mxu2 %vm1499_vm6, %v1543_v14  ;;  %v1592_v36 = vpack.c.b16 %v1591_v15, %v1591_v15  ;;  %v1653_v60 = vpack.c.b16 %v1652_v42, %v1652_v42  ;;  %v1715_v61 = vpack.c.b16 %v1714_v43, %v1714_v43 }
 0x1f5   :  { %2458 = vmatmul.msk.bf16.vlgmr.msrb.gmra.mxu3 %vm1499_vm6, %v1592_v36  ;;  %2489 = vmatmul.msk.bf16.vlgmr.msrb.gmra.mxu0 %vm1499_vm6, %v1653_v60 }
 0x1f6   :  { %2520 = vmatmul.msk.bf16.vlgmr.msrb.gmra.mxu1 %vm1499_vm6, %v1715_v61 }
 0x272   :  { %v1696_v0 = vpop.f32.mrf.mxu0 }
 0x273   :  { %v1758_v3 = vpop.f32.mrf.mxu1 }
 0x276   :  { %v1586_v6 = vpop.f32.mrf.mxu2 }
 0x278   :  { %v1635_v40 = vpop.f32.mrf.mxu3 }
 0x279   :  { %v1636_v52 = vadd.f32 %v1635_v40, %v1586_v6 }
 0x27a   :  { %v1698_v53 = vpop.f32.mrf.mxu0 }
 0x27b   :  { %v1700_v49 = vadd.f32 %v1696_v0, %v1636_v52  ;;  %v1760_v23 = vpop.f32.mrf.mxu1 }
 0x27d   :  { %v1762_v41 = vadd.f32 %v1758_v3, %v1700_v49 }
 0x27e   :  { %v1588_v7 = vpop.f32.mrf.mxu2 }
 0x27f   :  { %v1767_v8 = vadd.f32 %v2650_v22, %v1762_v41 }
 0x280   :  { %v1637_v9 = vpop.f32.mrf.mxu3 }
 0x281   :  { %v1768_v12 = vmax.f32 %v1767_v8, 0.0 }
 0x283   :  { %v1769_v39 = vpack.c.bf16 %v1768_v12, %v1768_v12 }
 0x285   :  { %2533 = vmatmul.msk.bf16.vlgmr.msra.gmra.mxu2 %vm1802_vm9, %v1769_v39 }
 0x308   :  { %v1819_v13 = vpop.f32.mrf.mxu2 }
 0x309   :  { %v1820_v16 = vadd.f32 %v2651_v4, %v1819_v13 }
 0x30b   :  { %v1824_v10 = vsel %vm1823_vm10, %v1820_v16, -inf }
 0x30c   :  { %1825 = vmax.xlane.f32.xlu0 %v1824_v10 }
 0x310   :  { %v1821_v11 = vpop.f32.mrf.mxu2 }
 0x37f   :  { %v1826_v17 = vpop.xlane.xlu0 %1825 }
 0x380   :  { %v1827_v33 = vsub.f32 %v1820_v16, %v1826_v17 }
 0x382   :  { %v1828_v5 = vmul.f32 1.442695, %v1827_v33 }
 0x384   :  { %2652 = vpow2.f32 %v1828_v5 }
 0x38a   :  { %v2653_v55 = vpop.eup %2652 }
 0x38b   :  { %v1830_v54 = vsel %vm1823_vm10, %v2653_v55, 0.0 }
 0x38c   :  { %1831 = vadd.xlane.f32.xlu0 %v1830_v54 }
 0x3ff   :  { %v1832_v50 = vpop.xlane.xlu0 %1831 }
 0x400   :  { %2654 = vrcp.f32 %v1832_v50 }
 0x406   :  { %v2655_v51 = vpop.eup %2654 }
 0x407   :  { %v1834_v56 = vmul.f32 %v2655_v51, %v1832_v50 }
 0x409   :  { %v1835_v18 = vsub.f32 2.0, %v1834_v56 }
 0x40b   :  { %v1836_v19 = vmul.f32 %v2655_v51, %v1835_v18 }
 0x40d   :  { %v1837_v20 = vmul.f32 %v2653_v55, %v1836_v19 }
 0x40f   :  { %1838 = vst.msk [vmem:[#allocation4] sm:$0x3] %vm1823_vm10, %v1837_v20 }
 0x410   :  { %1849 = dma.vmem_to_hbm [thread:$0]  %s1845_s10, 32, %s1847_s23, [#allocation5]  }
 0x411   :  { %2680 = dma.done.wait [#allocation5], 32  }
 0x412   :  { %2681 = vsyncadd [#allocation5], 4294967264 }
 0x413   :  { %1854 = vsyncpa [#allocation5], 1 }

</bundles_post_ra>
